<compile_context>
chip_gen: v7x
topology: tpu7x:2x2x1
jax: 0.10.0
libtpu: 0.0.40
codegen_flags: <defaults>
</compile_context>

<pallas_src>
import numpy as np
import jax
import jax.numpy as jnp
from jax import lax
from jax.experimental import pallas as pl
from jax.experimental.pallas import tpu as pltpu


# ----------------------------- fused Pallas kernel ---------------------------

def decoder_kernel(xt_ref, xb_ref, lw_ref, lb_ref,
                   wt0_ref, at0_ref, sc0_ref, sh0_ref,
                   wt1_ref, at1_ref, sc1_ref, sh1_ref,
                   wt2_ref, at2_ref, sc2_ref, sh2_ref,
                   hwt_ref, scal_ref, o_ref):
    # scal_ref (SMEM, f32[5]): swish betas for [dense, block0, block1, block2],
    #                          then the 1x1-head bias.

    # ---- multiply + dense + trainable swish ---------------------------------
    x = xt_ref[0] * xb_ref[0]                                      # (1, hidden) f32
    y = jnp.dot(x.astype(jnp.bfloat16), lw_ref[...],
                preferred_element_type=jnp.float32) + lb_ref[...]   # (1, feat) f32
    y = y * jax.nn.sigmoid(scal_ref[0] * y)

    # ---- (1, feat) -> flattened NCHW (128, h0*w0) ---------------------------
    # lin_w columns were permuted host-side to p-major order, so consecutive
    # 128-lane chunks are spatial positions: stack them and transpose once.
    hw0 = at0_ref.shape[1]
    c0 = lw_ref.shape[1] // hw0
    chunks = [y[:, p * c0:(p + 1) * c0] for p in range(hw0)]       # hw0 x (1, c0)
    act = jnp.concatenate(chunks, axis=0).T                        # (c0, hw0) NCHW

    # ---- upsample + conv3x3 + (bias+BN folded) + swish ----------------------
    def block(x_nchw, wt_ref, at_ref, sc_ref, sh_ref, beta):
        n_taps, hw_in, hw_out = at_ref.shape
        cout = wt_ref.shape[0] // n_taps
        # all 9 taps of W_k^T @ X in one matmul: (9*Cout, Cin) @ (Cin, HWin)
        p_all = jnp.dot(wt_ref[...], x_nchw.astype(jnp.bfloat16),
                        preferred_element_type=jnp.float32)
        p_all = p_all.astype(jnp.bfloat16)
        acc = jnp.zeros((cout, hw_out), jnp.float32)
        for k in range(n_taps):                                    # statically unrolled
            acc = acc + jnp.dot(p_all[k * cout:(k + 1) * cout], at_ref[k],
                                preferred_element_type=jnp.float32)
        ybn = acc * sc_ref[...] + sh_ref[...]                      # conv-bias + BN(eval)
        return ybn * jax.nn.sigmoid(beta * ybn)                    # trainable swish

    act = block(act, wt0_ref, at0_ref, sc0_ref, sh0_ref, scal_ref[1])
    act = block(act, wt1_ref, at1_ref, sc1_ref, sh1_ref, scal_ref[2])
    act = block(act, wt2_ref, at2_ref, sc2_ref, sh2_ref, scal_ref[3])

    # ---- 1x1 conv head: lane-dense (1, nr*nz) output ------------------------
    out = jnp.dot(hwt_ref[...], act.astype(jnp.bfloat16),
                  preferred_element_type=jnp.float32) + scal_ref[4]
    o_ref[0] = out


# ------------------------------ pallas_call wrapper --------------------------

def decoder_forward(x_trunk, x_branch, params):
    n, hidden = x_branch.shape
    nr, nz = params["nr"], params["nz"]
    nrnz = nr * nz

    def full_spec(a):
        nd = a.ndim
        return pl.BlockSpec(a.shape, lambda b, _nd=nd: (0,) * _nd)

    args = [x_trunk.reshape(n, 1, hidden), x_branch.reshape(n, 1, hidden),
            params["lin_w_k"], params["lin_b_k"]]
    in_specs = [pl.BlockSpec((1, 1, hidden), lambda b: (b, 0, 0)),
                pl.BlockSpec((1, 1, hidden), lambda b: (b, 0, 0)),
                full_spec(params["lin_w_k"]), full_spec(params["lin_b_k"])]
    for blk in params["blocks_k"]:
        for name in ("wt", "at", "scale", "shift"):
            args.append(blk[name])
            in_specs.append(full_spec(blk[name]))
    args.append(params["head_wt"])
    in_specs.append(full_spec(params["head_wt"]))
    args.append(params["scalars"])
    in_specs.append(pl.BlockSpec(memory_space=pltpu.MemorySpace.SMEM))

    out = pl.pallas_call(
        decoder_kernel,
        out_shape=jax.ShapeDtypeStruct((n, 1, nrnz), jnp.float32),
        grid=(n,),
        in_specs=in_specs,
        out_specs=pl.BlockSpec((1, 1, nrnz), lambda b: (b, 0, 0)),
        compiler_params=pltpu.CompilerParams(dimension_semantics=("parallel",)),
    )(*args)
    return out.reshape(n, nr, nz)          # == PyTorch output after .squeeze()


# ------------------------------ constants / params ---------------------------

def bilinear_up_matrix(in_size):
    """1-D bilinear upsample-by-2 matrix, align_corners=True (UpsamplingBilinear2d)."""
    out_size = 2 * in_size
    L = np.zeros((out_size, in_size), dtype=np.float32)
    if in_size == 1:
        L[:, 0] = 1.0
        return L
    pos = np.arange(out_size, dtype=np.float64) * (in_size - 1) / (out_size - 1)
    lo = np.clip(np.floor(pos).astype(np.int64), 0, in_size - 2)
    frac = pos - lo
    for i in range(out_size):
        L[i, lo[i]] = 1.0 - frac[i]
        L[i, lo[i] + 1] = frac[i]
    return L


def shift_operators(hh, ww):
    """9 zero-padded shift matrices implementing a 3x3 'same' cross-correlation."""
    S = np.zeros((9, hh * ww, hh * ww), dtype=np.float32)
    for ky in range(3):
        for kx in range(3):
            k = ky * 3 + kx
            for h in range(hh):
                for w in range(ww):
                    sh, sw = h + ky - 1, w + kx - 1
                    if 0 <= sh < hh and 0 <= sw < ww:
                        S[k, h * ww + w, sh * ww + sw] = 1.0
    return S


def build_params(key, hidden_dim, nr, nz):
    h0, w0 = nr // 8, nz // 8
    hw0 = h0 * w0
    c0 = 128
    feat = c0 * hw0
    channels = [128, 32, 16, 8]
    eps = 1e-5
    keys = iter(jax.random.split(key, 32))

    lin_w = (jax.random.normal(next(keys), (hidden_dim, feat), jnp.float32)
             / np.sqrt(hidden_dim))
    lin_b = 0.01 * jax.random.normal(next(keys), (feat,), jnp.float32)
    # kernel copies: dense columns permuted from NCHW-flat (c-major) to p-major
    lin_w_k = lin_w.reshape(hidden_dim, c0, hw0).transpose(0, 2, 1).reshape(hidden_dim, feat)
    lin_b_k = lin_b.reshape(c0, hw0).T.reshape(1, feat)

    params = dict(nr=nr, nz=nz, h0=h0, w0=w0,
                  lin_w=lin_w, lin_b=lin_b,
                  lin_w_k=lin_w_k.astype(jnp.bfloat16),
                  lin_b_k=lin_b_k)

    blocks_k, blocks_r = [], []
    hh, ww = h0, w0
    for _ in range(3):
        cin, cout = channels[len(blocks_k)], channels[len(blocks_k) + 1]
        hout, wout = 2 * hh, 2 * ww
        w_hwio = (jax.random.normal(next(keys), (3, 3, cin, cout), jnp.float32)
                  / np.sqrt(9 * cin))
        b_conv = 0.01 * jax.random.normal(next(keys), (cout,), jnp.float32)
        gamma = jax.random.uniform(next(keys), (cout,), jnp.float32, 0.8, 1.2)
        bn_b = 0.1 * jax.random.normal(next(keys), (cout,), jnp.float32)
        mean = 0.1 * jax.random.normal(next(keys), (cout,), jnp.float32)
        var = jax.random.uniform(next(keys), (cout,), jnp.float32, 0.5, 1.5)
        scale = gamma / jnp.sqrt(var + eps)
        shift = bn_b - mean * scale + scale * b_conv      # fold conv bias into BN affine

        U = np.kron(bilinear_up_matrix(hh), bilinear_up_matrix(ww)).astype(np.float32)
        S = shift_operators(hout, wout)
        A = np.einsum("kop,pi->koi", S, U)                # A_k = S_k @ U  (HWout, HWin)
        At = np.ascontiguousarray(np.transpose(A, (0, 2, 1)))   # (9, HWin, HWout)

        w9 = w_hwio.reshape(9, cin, cout)                 # tap index k = ky*3 + kx
        wt_all = jnp.transpose(w9, (0, 2, 1)).reshape(9 * cout, cin)

        blocks_k.append(dict(wt=wt_all.astype(jnp.bfloat16),
                             at=jnp.asarray(At, jnp.bfloat16),
                             scale=scale.reshape(cout, 1),
                             shift=shift.reshape(cout, 1)))
        blocks_r.append(dict(w_hwio=w_hwio, b_conv=b_conv,
                             bn=(gamma, bn_b, mean, var)))
        hh, ww = hout, wout

    head_w = (jax.random.normal(next(keys), (channels[-1], 1), jnp.float32)
              / np.sqrt(channels[-1]))
    head_b = 0.01 * jax.random.normal(next(keys), (), jnp.float32)
    params["blocks_k"] = blocks_k
    params["blocks_r"] = blocks_r
    params["head_w"] = head_w
    params["head_b"] = head_b
    params["head_wt"] = head_w.T.astype(jnp.bfloat16)     # (1, C_last)
    # swish betas (TrainableSwish default 1.0) + head bias, kept in SMEM
    params["scalars"] = jnp.concatenate(
        [jnp.ones((4,), jnp.float32), head_b.reshape(1)])
    return params


# ------------------------------ pure-JAX reference ---------------------------

def reference_forward(x_trunk, x_branch, params):
    eps = 1e-5
    n = x_branch.shape[0]
    h0, w0 = params["h0"], params["w0"]
    x = x_branch * x_trunk
    y = jnp.dot(x, params["lin_w"], precision=lax.Precision.HIGHEST) + params["lin_b"]
    y = y * jax.nn.sigmoid(params["scalars"][0] * y)
    y = y.reshape(n, 128, h0, w0).transpose(0, 2, 3, 1)    # NHWC
    hh, ww = h0, w0
    for i, blk in enumerate(params["blocks_r"]):
        Lh = jnp.asarray(bilinear_up_matrix(hh))
        Lw = jnp.asarray(bilinear_up_matrix(ww))
        y = jnp.einsum("ph,nhwc->npwc", Lh, y, precision=lax.Precision.HIGHEST)
        y = jnp.einsum("qw,npwc->npqc", Lw, y, precision=lax.Precision.HIGHEST)
        y = lax.conv_general_dilated(
            y, blk["w_hwio"], (1, 1), "SAME",
            dimension_numbers=("NHWC", "HWIO", "NHWC"),
            precision=lax.Precision.HIGHEST) + blk["b_conv"]
        gamma, bn_b, mean, var = blk["bn"]
        y = (y - mean) / jnp.sqrt(var + eps) * gamma + bn_b
        y = y * jax.nn.sigmoid(params["scalars"][1 + i] * y)
        hh, ww = 2 * hh, 2 * ww
    y = jnp.einsum("nhwc,co->nhwo", y, params["head_w"],
                   precision=lax.Precision.HIGHEST) + params["head_b"]
    return y[..., 0]


# --------------------------------- main ---------------------------------------

if __name__ == "__main__":
    hidden_dim, nr, nz, batch = 32, 16, 16, 2
    key = jax.random.PRNGKey(0)
    kp, kt, kb = jax.random.split(key, 3)
    params = build_params(kp, hidden_dim, nr, nz)
    x_trunk = jax.random.normal(kt, (batch, hidden_dim), jnp.float32)
    x_branch = jax.random.normal(kb, (batch, hidden_dim), jnp.float32)

    out = jax.block_until_ready(decoder_forward(x_trunk, x_branch, params))
    ref = jax.block_until_ready(reference_forward(x_trunk, x_branch, params))

    assert out.shape == (batch, nr, nz), out.shape
    # Tolerance covers bf16 matmul-operand casting (f32 accumulation/elementwise);
    # the reference is full f32.
    o, r = np.asarray(out), np.asarray(ref)
    if not np.allclose(o, r, rtol=4e-2, atol=4e-2):
        raise AssertionError(
            f"Pallas decoder does not match JAX reference, "
            f"max abs err = {np.max(np.abs(o - r))}")
    print("KERNEL_OK")
</pallas_src>

<mosaic_0001>
module attributes {stable_mosaic.version = 11 : i64} {
  func.func @decoder_kernel(%arg0: i32, %arg1: memref<1x1x32xf32, #tpu.memory_space<vmem>>, %arg2: memref<1x1x32xf32, #tpu.memory_space<vmem>>, %arg3: memref<32x512xbf16, #tpu.memory_space<vmem>>, %arg4: memref<1x512xf32, #tpu.memory_space<vmem>>, %arg5: memref<288x128xbf16, #tpu.memory_space<vmem>>, %arg6: memref<9x4x16xbf16, #tpu.memory_space<vmem>>, %arg7: memref<32x1xf32, #tpu.memory_space<vmem>>, %arg8: memref<32x1xf32, #tpu.memory_space<vmem>>, %arg9: memref<144x32xbf16, #tpu.memory_space<vmem>>, %arg10: memref<9x16x64xbf16, #tpu.memory_space<vmem>>, %arg11: memref<16x1xf32, #tpu.memory_space<vmem>>, %arg12: memref<16x1xf32, #tpu.memory_space<vmem>>, %arg13: memref<72x16xbf16, #tpu.memory_space<vmem>>, %arg14: memref<9x64x256xbf16, #tpu.memory_space<vmem>>, %arg15: memref<8x1xf32, #tpu.memory_space<vmem>>, %arg16: memref<8x1xf32, #tpu.memory_space<vmem>>, %arg17: memref<1x8xbf16, #tpu.memory_space<vmem>>, %arg18: memref<5xf32, #tpu.memory_space<smem>>, %arg19: memref<1x1x256xf32, #tpu.memory_space<vmem>>) attributes {dimension_semantics = [#tpu.dimension_semantics<parallel>], iteration_bounds = array<i64: 2>, scalar_prefetch = 0 : i64, scratch_operands = 0 : i64, tpu.core_type = #tpu.core_type<tc>, window_params = [{transform_indices = @transform_0, window_bounds = array<i64: 1, 1, 32>}, {transform_indices = @transform_1, window_bounds = array<i64: 1, 1, 32>}, {pipeline_mode = #tpu.pipeline_mode<synchronous>, transform_indices = @transform_2, window_bounds = array<i64: 32, 512>}, {pipeline_mode = #tpu.pipeline_mode<synchronous>, transform_indices = @transform_3, window_bounds = array<i64: 1, 512>}, {pipeline_mode = #tpu.pipeline_mode<synchronous>, transform_indices = @transform_4, window_bounds = array<i64: 288, 128>}, {pipeline_mode = #tpu.pipeline_mode<synchronous>, transform_indices = @transform_5, window_bounds = array<i64: 9, 4, 16>}, {pipeline_mode = #tpu.pipeline_mode<synchronous>, transform_indices = @transform_6, window_bounds = array<i64: 32, 1>}, {pipeline_mode = #tpu.pipeline_mode<synchronous>, transform_indices = @transform_7, window_bounds = array<i64: 32, 1>}, {pipeline_mode = #tpu.pipeline_mode<synchronous>, transform_indices = @transform_8, window_bounds = array<i64: 144, 32>}, {pipeline_mode = #tpu.pipeline_mode<synchronous>, transform_indices = @transform_9, window_bounds = array<i64: 9, 16, 64>}, {pipeline_mode = #tpu.pipeline_mode<synchronous>, transform_indices = @transform_10, window_bounds = array<i64: 16, 1>}, {pipeline_mode = #tpu.pipeline_mode<synchronous>, transform_indices = @transform_11, window_bounds = array<i64: 16, 1>}, {pipeline_mode = #tpu.pipeline_mode<synchronous>, transform_indices = @transform_12, window_bounds = array<i64: 72, 16>}, {pipeline_mode = #tpu.pipeline_mode<synchronous>, transform_indices = @transform_13, window_bounds = array<i64: 9, 64, 256>}, {pipeline_mode = #tpu.pipeline_mode<synchronous>, transform_indices = @transform_14, window_bounds = array<i64: 8, 1>}, {pipeline_mode = #tpu.pipeline_mode<synchronous>, transform_indices = @transform_15, window_bounds = array<i64: 8, 1>}, {pipeline_mode = #tpu.pipeline_mode<synchronous>, transform_indices = @transform_16, window_bounds = array<i64: 1, 8>}, {transform_indices = @transform_17, window_bounds = array<i64: 5>}, {transform_indices = @transform_18, window_bounds = array<i64: 1, 1, 256>}]} {
    %c0 = arith.constant 0 : index
    %c0_0 = arith.constant 0 : index
    %c0_1 = arith.constant 0 : index
    %0 = vector.load %arg1[%c0, %c0_0, %c0_1] : memref<1x1x32xf32, #tpu.memory_space<vmem>>, vector<1x1x32xf32>
    %1 = vector.shape_cast %0 : vector<1x1x32xf32> to vector<1x32xf32>
    %c0_2 = arith.constant 0 : index
    %c0_3 = arith.constant 0 : index
    %c0_4 = arith.constant 0 : index
    %2 = vector.load %arg2[%c0_2, %c0_3, %c0_4] : memref<1x1x32xf32, #tpu.memory_space<vmem>>, vector<1x1x32xf32>
    %3 = vector.shape_cast %2 : vector<1x1x32xf32> to vector<1x32xf32>
    %4 = arith.mulf %1, %3 : vector<1x32xf32>
    %5 = arith.truncf %4 : vector<1x32xf32> to vector<1x32xbf16>
    %c0_5 = arith.constant 0 : index
    %c0_6 = arith.constant 0 : index
    %6 = vector.load %arg3[%c0_5, %c0_6] : memref<32x512xbf16, #tpu.memory_space<vmem>>, vector<32x512xbf16>
    %cst = arith.constant dense<0.000000e+00> : vector<1x512xf32>
    %7 = tpu.matmul %5, %6, %cst {dimension_numbers = #tpu.dot_dimension_numbers<[1], [0], [0], [1], [0, 0, 1, 1], [], []>} : vector<1x32xbf16>, vector<32x512xbf16>, vector<1x512xf32> -> vector<1x512xf32>
    %c0_7 = arith.constant 0 : index
    %c0_8 = arith.constant 0 : index
    %8 = vector.load %arg4[%c0_7, %c0_8] : memref<1x512xf32, #tpu.memory_space<vmem>>, vector<1x512xf32>
    %9 = arith.addf %7, %8 : vector<1x512xf32>
    %c0_9 = arith.constant 0 : index
    %10 = memref.load %arg18[%c0_9] : memref<5xf32, #tpu.memory_space<smem>>
    %11 = vector.broadcast %10 : f32 to vector<1x512xf32>
    %12 = arith.mulf %11, %9 : vector<1x512xf32>
    %13 = arith.negf %12 : vector<1x512xf32>
    %14 = math.exp %13 : vector<1x512xf32>
    %cst_10 = arith.constant 1.000000e+00 : f32
    %15 = vector.broadcast %cst_10 : f32 to vector<1x512xf32>
    %16 = arith.addf %15, %14 : vector<1x512xf32>
    %17 = arith.divf %15, %16 : vector<1x512xf32>
    %18 = arith.mulf %9, %17 : vector<1x512xf32>
    %19 = vector.extract_strided_slice %18 {offsets = [0, 0], sizes = [1, 128], strides = [1, 1]} : vector<1x512xf32> to vector<1x128xf32>
    %20 = vector.extract_strided_slice %18 {offsets = [0, 128], sizes = [1, 128], strides = [1, 1]} : vector<1x512xf32> to vector<1x128xf32>
    %21 = vector.extract_strided_slice %18 {offsets = [0, 256], sizes = [1, 128], strides = [1, 1]} : vector<1x512xf32> to vector<1x128xf32>
    %22 = vector.extract_strided_slice %18 {offsets = [0, 384], sizes = [1, 128], strides = [1, 1]} : vector<1x512xf32> to vector<1x128xf32>
    %23 = tpu.concatenate %19, %20, %21, %22 in 0 : vector<1x128xf32>, vector<1x128xf32>, vector<1x128xf32>, vector<1x128xf32> -> vector<4x128xf32>
    %24 = tpu.transpose %23, [1, 0] : vector<4x128xf32> -> vector<128x4xf32>
    %c1 = arith.constant 1 : index
    %25 = memref.load %arg18[%c1] : memref<5xf32, #tpu.memory_space<smem>>
    %c0_11 = arith.constant 0 : index
    %c0_12 = arith.constant 0 : index
    %26 = vector.load %arg5[%c0_11, %c0_12] : memref<288x128xbf16, #tpu.memory_space<vmem>>, vector<288x128xbf16>
    %27 = arith.truncf %24 : vector<128x4xf32> to vector<128x4xbf16>
    %cst_13 = arith.constant dense<0.000000e+00> : vector<288x4xf32>
    %28 = tpu.matmul %26, %27, %cst_13 {dimension_numbers = #tpu.dot_dimension_numbers<[1], [0], [0], [1], [0, 0, 1, 1], [], []>} : vector<288x128xbf16>, vector<128x4xbf16>, vector<288x4xf32> -> vector<288x4xf32>
    %29 = arith.truncf %28 : vector<288x4xf32> to vector<288x4xbf16>
    %cst_14 = arith.constant 0.000000e+00 : f32
    %30 = vector.broadcast %cst_14 : f32 to vector<32x16xf32>
    %31 = vector.extract_strided_slice %29 {offsets = [0, 0], sizes = [32, 4], strides = [1, 1]} : vector<288x4xbf16> to vector<32x4xbf16>
    %c0_15 = arith.constant 0 : index
    %c0_16 = arith.constant 0 : index
    %c0_17 = arith.constant 0 : index
    %32 = vector.load %arg6[%c0_15, %c0_16, %c0_17] : memref<9x4x16xbf16, #tpu.memory_space<vmem>>, vector<1x4x16xbf16>
    %33 = vector.shape_cast %32 : vector<1x4x16xbf16> to vector<4x16xbf16>
    %cst_18 = arith.constant dense<0.000000e+00> : vector<32x16xf32>
    %34 = tpu.matmul %31, %33, %cst_18 {dimension_numbers = #tpu.dot_dimension_numbers<[1], [0], [0], [1], [0, 0, 1, 1], [], []>} : vector<32x4xbf16>, vector<4x16xbf16>, vector<32x16xf32> -> vector<32x16xf32>
    %35 = arith.addf %30, %34 : vector<32x16xf32>
    %36 = vector.extract_strided_slice %29 {offsets = [32, 0], sizes = [32, 4], strides = [1, 1]} : vector<288x4xbf16> to vector<32x4xbf16>
    %c1_19 = arith.constant 1 : index
    %c0_20 = arith.constant 0 : index
    %c0_21 = arith.constant 0 : index
    %37 = vector.load %arg6[%c1_19, %c0_20, %c0_21] : memref<9x4x16xbf16, #tpu.memory_space<vmem>>, vector<1x4x16xbf16>
    %38 = vector.shape_cast %37 : vector<1x4x16xbf16> to vector<4x16xbf16>
    %cst_22 = arith.constant dense<0.000000e+00> : vector<32x16xf32>
    %39 = tpu.matmul %36, %38, %cst_22 {dimension_numbers = #tpu.dot_dimension_numbers<[1], [0], [0], [1], [0, 0, 1, 1], [], []>} : vector<32x4xbf16>, vector<4x16xbf16>, vector<32x16xf32> -> vector<32x16xf32>
    %40 = arith.addf %35, %39 : vector<32x16xf32>
    %41 = vector.extract_strided_slice %29 {offsets = [64, 0], sizes = [32, 4], strides = [1, 1]} : vector<288x4xbf16> to vector<32x4xbf16>
    %c2 = arith.constant 2 : index
    %c0_23 = arith.constant 0 : index
    %c0_24 = arith.constant 0 : index
    %42 = vector.load %arg6[%c2, %c0_23, %c0_24] : memref<9x4x16xbf16, #tpu.memory_space<vmem>>, vector<1x4x16xbf16>
    %43 = vector.shape_cast %42 : vector<1x4x16xbf16> to vector<4x16xbf16>
    %cst_25 = arith.constant dense<0.000000e+00> : vector<32x16xf32>
    %44 = tpu.matmul %41, %43, %cst_25 {dimension_numbers = #tpu.dot_dimension_numbers<[1], [0], [0], [1], [0, 0, 1, 1], [], []>} : vector<32x4xbf16>, vector<4x16xbf16>, vector<32x16xf32> -> vector<32x16xf32>
    %45 = arith.addf %40, %44 : vector<32x16xf32>
    %46 = vector.extract_strided_slice %29 {offsets = [96, 0], sizes = [32, 4], strides = [1, 1]} : vector<288x4xbf16> to vector<32x4xbf16>
    %c3 = arith.constant 3 : index
    %c0_26 = arith.constant 0 : index
    %c0_27 = arith.constant 0 : index
    %47 = vector.load %arg6[%c3, %c0_26, %c0_27] : memref<9x4x16xbf16, #tpu.memory_space<vmem>>, vector<1x4x16xbf16>
    %48 = vector.shape_cast %47 : vector<1x4x16xbf16> to vector<4x16xbf16>
    %cst_28 = arith.constant dense<0.000000e+00> : vector<32x16xf32>
    %49 = tpu.matmul %46, %48, %cst_28 {dimension_numbers = #tpu.dot_dimension_numbers<[1], [0], [0], [1], [0, 0, 1, 1], [], []>} : vector<32x4xbf16>, vector<4x16xbf16>, vector<32x16xf32> -> vector<32x16xf32>
    %50 = arith.addf %45, %49 : vector<32x16xf32>
    %51 = vector.extract_strided_slice %29 {offsets = [128, 0], sizes = [32, 4], strides = [1, 1]} : vector<288x4xbf16> to vector<32x4xbf16>
    %c4 = arith.constant 4 : index
    %c0_29 = arith.constant 0 : index
    %c0_30 = arith.constant 0 : index
    %52 = vector.load %arg6[%c4, %c0_29, %c0_30] : memref<9x4x16xbf16, #tpu.memory_space<vmem>>, vector<1x4x16xbf16>
    %53 = vector.shape_cast %52 : vector<1x4x16xbf16> to vector<4x16xbf16>
    %cst_31 = arith.constant dense<0.000000e+00> : vector<32x16xf32>
    %54 = tpu.matmul %51, %53, %cst_31 {dimension_numbers = #tpu.dot_dimension_numbers<[1], [0], [0], [1], [0, 0, 1, 1], [], []>} : vector<32x4xbf16>, vector<4x16xbf16>, vector<32x16xf32> -> vector<32x16xf32>
    %55 = arith.addf %50, %54 : vector<32x16xf32>
    %56 = vector.extract_strided_slice %29 {offsets = [160, 0], sizes = [32, 4], strides = [1, 1]} : vector<288x4xbf16> to vector<32x4xbf16>
    %c5 = arith.constant 5 : index
    %c0_32 = arith.constant 0 : index
    %c0_33 = arith.constant 0 : index
    %57 = vector.load %arg6[%c5, %c0_32, %c0_33] : memref<9x4x16xbf16, #tpu.memory_space<vmem>>, vector<1x4x16xbf16>
    %58 = vector.shape_cast %57 : vector<1x4x16xbf16> to vector<4x16xbf16>
    %cst_34 = arith.constant dense<0.000000e+00> : vector<32x16xf32>
    %59 = tpu.matmul %56, %58, %cst_34 {dimension_numbers = #tpu.dot_dimension_numbers<[1], [0], [0], [1], [0, 0, 1, 1], [], []>} : vector<32x4xbf16>, vector<4x16xbf16>, vector<32x16xf32> -> vector<32x16xf32>
    %60 = arith.addf %55, %59 : vector<32x16xf32>
    %61 = vector.extract_strided_slice %29 {offsets = [192, 0], sizes = [32, 4], strides = [1, 1]} : vector<288x4xbf16> to vector<32x4xbf16>
    %c6 = arith.constant 6 : index
    %c0_35 = arith.constant 0 : index
    %c0_36 = arith.constant 0 : index
    %62 = vector.load %arg6[%c6, %c0_35, %c0_36] : memref<9x4x16xbf16, #tpu.memory_space<vmem>>, vector<1x4x16xbf16>
    %63 = vector.shape_cast %62 : vector<1x4x16xbf16> to vector<4x16xbf16>
    %cst_37 = arith.constant dense<0.000000e+00> : vector<32x16xf32>
    %64 = tpu.matmul %61, %63, %cst_37 {dimension_numbers = #tpu.dot_dimension_numbers<[1], [0], [0], [1], [0, 0, 1, 1], [], []>} : vector<32x4xbf16>, vector<4x16xbf16>, vector<32x16xf32> -> vector<32x16xf32>
    %65 = arith.addf %60, %64 : vector<32x16xf32>
    %66 = vector.extract_strided_slice %29 {offsets = [224, 0], sizes = [32, 4], strides = [1, 1]} : vector<288x4xbf16> to vector<32x4xbf16>
    %c7 = arith.constant 7 : index
    %c0_38 = arith.constant 0 : index
    %c0_39 = arith.constant 0 : index
    %67 = vector.load %arg6[%c7, %c0_38, %c0_39] : memref<9x4x16xbf16, #tpu.memory_space<vmem>>, vector<1x4x16xbf16>
    %68 = vector.shape_cast %67 : vector<1x4x16xbf16> to vector<4x16xbf16>
    %cst_40 = arith.constant dense<0.000000e+00> : vector<32x16xf32>
    %69 = tpu.matmul %66, %68, %cst_40 {dimension_numbers = #tpu.dot_dimension_numbers<[1], [0], [0], [1], [0, 0, 1, 1], [], []>} : vector<32x4xbf16>, vector<4x16xbf16>, vector<32x16xf32> -> vector<32x16xf32>
    %70 = arith.addf %65, %69 : vector<32x16xf32>
    %71 = vector.extract_strided_slice %29 {offsets = [256, 0], sizes = [32, 4], strides = [1, 1]} : vector<288x4xbf16> to vector<32x4xbf16>
    %c8 = arith.constant 8 : index
    %c0_41 = arith.constant 0 : index
    %c0_42 = arith.constant 0 : index
    %72 = vector.load %arg6[%c8, %c0_41, %c0_42] : memref<9x4x16xbf16, #tpu.memory_space<vmem>>, vector<1x4x16xbf16>
    %73 = vector.shape_cast %72 : vector<1x4x16xbf16> to vector<4x16xbf16>
    %cst_43 = arith.constant dense<0.000000e+00> : vector<32x16xf32>
    %74 = tpu.matmul %71, %73, %cst_43 {dimension_numbers = #tpu.dot_dimension_numbers<[1], [0], [0], [1], [0, 0, 1, 1], [], []>} : vector<32x4xbf16>, vector<4x16xbf16>, vector<32x16xf32> -> vector<32x16xf32>
    %75 = arith.addf %70, %74 : vector<32x16xf32>
    %c0_44 = arith.constant 0 : index
    %c0_45 = arith.constant 0 : index
    %76 = vector.load %arg7[%c0_44, %c0_45] : memref<32x1xf32, #tpu.memory_space<vmem>>, vector<32x1xf32>
    %77 = vector.broadcast %76 : vector<32x1xf32> to vector<32x16xf32>
    %78 = arith.mulf %75, %77 : vector<32x16xf32>
    %c0_46 = arith.constant 0 : index
    %c0_47 = arith.constant 0 : index
    %79 = vector.load %arg8[%c0_46, %c0_47] : memref<32x1xf32, #tpu.memory_space<vmem>>, vector<32x1xf32>
    %80 = vector.broadcast %79 : vector<32x1xf32> to vector<32x16xf32>
    %81 = arith.addf %78, %80 : vector<32x16xf32>
    %82 = vector.broadcast %25 : f32 to vector<32x16xf32>
    %83 = arith.mulf %82, %81 : vector<32x16xf32>
    %84 = arith.negf %83 : vector<32x16xf32>
    %85 = math.exp %84 : vector<32x16xf32>
    %cst_48 = arith.constant 1.000000e+00 : f32
    %86 = vector.broadcast %cst_48 : f32 to vector<32x16xf32>
    %87 = arith.addf %86, %85 : vector<32x16xf32>
    %88 = arith.divf %86, %87 : vector<32x16xf32>
    %89 = arith.mulf %81, %88 : vector<32x16xf32>
    %c2_49 = arith.constant 2 : index
    %90 = memref.load %arg18[%c2_49] : memref<5xf32, #tpu.memory_space<smem>>
    %c0_50 = arith.constant 0 : index
    %c0_51 = arith.constant 0 : index
    %91 = vector.load %arg9[%c0_50, %c0_51] : memref<144x32xbf16, #tpu.memory_space<vmem>>, vector<144x32xbf16>
    %92 = arith.truncf %89 : vector<32x16xf32> to vector<32x16xbf16>
    %cst_52 = arith.constant dense<0.000000e+00> : vector<144x16xf32>
    %93 = tpu.matmul %91, %92, %cst_52 {dimension_numbers = #tpu.dot_dimension_numbers<[1], [0], [0], [1], [0, 0, 1, 1], [], []>} : vector<144x32xbf16>, vector<32x16xbf16>, vector<144x16xf32> -> vector<144x16xf32>
    %94 = arith.truncf %93 : vector<144x16xf32> to vector<144x16xbf16>
    %cst_53 = arith.constant 0.000000e+00 : f32
    %95 = vector.broadcast %cst_53 : f32 to vector<16x64xf32>
    %96 = vector.extract_strided_slice %94 {offsets = [0, 0], sizes = [16, 16], strides = [1, 1]} : vector<144x16xbf16> to vector<16x16xbf16>
    %c0_54 = arith.constant 0 : index
    %c0_55 = arith.constant 0 : index
    %c0_56 = arith.constant 0 : index
    %97 = vector.load %arg10[%c0_54, %c0_55, %c0_56] : memref<9x16x64xbf16, #tpu.memory_space<vmem>>, vector<1x16x64xbf16>
    %98 = vector.shape_cast %97 : vector<1x16x64xbf16> to vector<16x64xbf16>
    %cst_57 = arith.constant dense<0.000000e+00> : vector<16x64xf32>
    %99 = tpu.matmul %96, %98, %cst_57 {dimension_numbers = #tpu.dot_dimension_numbers<[1], [0], [0], [1], [0, 0, 1, 1], [], []>} : vector<16x16xbf16>, vector<16x64xbf16>, vector<16x64xf32> -> vector<16x64xf32>
    %100 = arith.addf %95, %99 : vector<16x64xf32>
    %101 = vector.extract_strided_slice %94 {offsets = [16, 0], sizes = [16, 16], strides = [1, 1]} : vector<144x16xbf16> to vector<16x16xbf16>
    %c1_58 = arith.constant 1 : index
    %c0_59 = arith.constant 0 : index
    %c0_60 = arith.constant 0 : index
    %102 = vector.load %arg10[%c1_58, %c0_59, %c0_60] : memref<9x16x64xbf16, #tpu.memory_space<vmem>>, vector<1x16x64xbf16>
    %103 = vector.shape_cast %102 : vector<1x16x64xbf16> to vector<16x64xbf16>
    %cst_61 = arith.constant dense<0.000000e+00> : vector<16x64xf32>
    %104 = tpu.matmul %101, %103, %cst_61 {dimension_numbers = #tpu.dot_dimension_numbers<[1], [0], [0], [1], [0, 0, 1, 1], [], []>} : vector<16x16xbf16>, vector<16x64xbf16>, vector<16x64xf32> -> vector<16x64xf32>
    %105 = arith.addf %100, %104 : vector<16x64xf32>
    %106 = vector.extract_strided_slice %94 {offsets = [32, 0], sizes = [16, 16], strides = [1, 1]} : vector<144x16xbf16> to vector<16x16xbf16>
    %c2_62 = arith.constant 2 : index
    %c0_63 = arith.constant 0 : index
    %c0_64 = arith.constant 0 : index
    %107 = vector.load %arg10[%c2_62, %c0_63, %c0_64] : memref<9x16x64xbf16, #tpu.memory_space<vmem>>, vector<1x16x64xbf16>
    %108 = vector.shape_cast %107 : vector<1x16x64xbf16> to vector<16x64xbf16>
    %cst_65 = arith.constant dense<0.000000e+00> : vector<16x64xf32>
    %109 = tpu.matmul %106, %108, %cst_65 {dimension_numbers = #tpu.dot_dimension_numbers<[1], [0], [0], [1], [0, 0, 1, 1], [], []>} : vector<16x16xbf16>, vector<16x64xbf16>, vector<16x64xf32> -> vector<16x64xf32>
    %110 = arith.addf %105, %109 : vector<16x64xf32>
    %111 = vector.extract_strided_slice %94 {offsets = [48, 0], sizes = [16, 16], strides = [1, 1]} : vector<144x16xbf16> to vector<16x16xbf16>
    %c3_66 = arith.constant 3 : index
    %c0_67 = arith.constant 0 : index
    %c0_68 = arith.constant 0 : index
    %112 = vector.load %arg10[%c3_66, %c0_67, %c0_68] : memref<9x16x64xbf16, #tpu.memory_space<vmem>>, vector<1x16x64xbf16>
    %113 = vector.shape_cast %112 : vector<1x16x64xbf16> to vector<16x64xbf16>
    %cst_69 = arith.constant dense<0.000000e+00> : vector<16x64xf32>
    %114 = tpu.matmul %111, %113, %cst_69 {dimension_numbers = #tpu.dot_dimension_numbers<[1], [0], [0], [1], [0, 0, 1, 1], [], []>} : vector<16x16xbf16>, vector<16x64xbf16>, vector<16x64xf32> -> vector<16x64xf32>
    %115 = arith.addf %110, %114 : vector<16x64xf32>
    %116 = vector.extract_strided_slice %94 {offsets = [64, 0], sizes = [16, 16], strides = [1, 1]} : vector<144x16xbf16> to vector<16x16xbf16>
    %c4_70 = arith.constant 4 : index
    %c0_71 = arith.constant 0 : index
    %c0_72 = arith.constant 0 : index
    %117 = vector.load %arg10[%c4_70, %c0_71, %c0_72] : memref<9x16x64xbf16, #tpu.memory_space<vmem>>, vector<1x16x64xbf16>
    %118 = vector.shape_cast %117 : vector<1x16x64xbf16> to vector<16x64xbf16>
    %cst_73 = arith.constant dense<0.000000e+00> : vector<16x64xf32>
    %119 = tpu.matmul %116, %118, %cst_73 {dimension_numbers = #tpu.dot_dimension_numbers<[1], [0], [0], [1], [0, 0, 1, 1], [], []>} : vector<16x16xbf16>, vector<16x64xbf16>, vector<16x64xf32> -> vector<16x64xf32>
    %120 = arith.addf %115, %119 : vector<16x64xf32>
    %121 = vector.extract_strided_slice %94 {offsets = [80, 0], sizes = [16, 16], strides = [1, 1]} : vector<144x16xbf16> to vector<16x16xbf16>
    %c5_74 = arith.constant 5 : index
    %c0_75 = arith.constant 0 : index
    %c0_76 = arith.constant 0 : index
    %122 = vector.load %arg10[%c5_74, %c0_75, %c0_76] : memref<9x16x64xbf16, #tpu.memory_space<vmem>>, vector<1x16x64xbf16>
    %123 = vector.shape_cast %122 : vector<1x16x64xbf16> to vector<16x64xbf16>
    %cst_77 = arith.constant dense<0.000000e+00> : vector<16x64xf32>
    %124 = tpu.matmul %121, %123, %cst_77 {dimension_numbers = #tpu.dot_dimension_numbers<[1], [0], [0], [1], [0, 0, 1, 1], [], []>} : vector<16x16xbf16>, vector<16x64xbf16>, vector<16x64xf32> -> vector<16x64xf32>
    %125 = arith.addf %120, %124 : vector<16x64xf32>
    %126 = vector.extract_strided_slice %94 {offsets = [96, 0], sizes = [16, 16], strides = [1, 1]} : vector<144x16xbf16> to vector<16x16xbf16>
    %c6_78 = arith.constant 6 : index
    %c0_79 = arith.constant 0 : index
    %c0_80 = arith.constant 0 : index
    %127 = vector.load %arg10[%c6_78, %c0_79, %c0_80] : memref<9x16x64xbf16, #tpu.memory_space<vmem>>, vector<1x16x64xbf16>
    %128 = vector.shape_cast %127 : vector<1x16x64xbf16> to vector<16x64xbf16>
    %cst_81 = arith.constant dense<0.000000e+00> : vector<16x64xf32>
    %129 = tpu.matmul %126, %128, %cst_81 {dimension_numbers = #tpu.dot_dimension_numbers<[1], [0], [0], [1], [0, 0, 1, 1], [], []>} : vector<16x16xbf16>, vector<16x64xbf16>, vector<16x64xf32> -> vector<16x64xf32>
    %130 = arith.addf %125, %129 : vector<16x64xf32>
    %131 = vector.extract_strided_slice %94 {offsets = [112, 0], sizes = [16, 16], strides = [1, 1]} : vector<144x16xbf16> to vector<16x16xbf16>
    %c7_82 = arith.constant 7 : index
    %c0_83 = arith.constant 0 : index
    %c0_84 = arith.constant 0 : index
    %132 = vector.load %arg10[%c7_82, %c0_83, %c0_84] : memref<9x16x64xbf16, #tpu.memory_space<vmem>>, vector<1x16x64xbf16>
    %133 = vector.shape_cast %132 : vector<1x16x64xbf16> to vector<16x64xbf16>
    %cst_85 = arith.constant dense<0.000000e+00> : vector<16x64xf32>
    %134 = tpu.matmul %131, %133, %cst_85 {dimension_numbers = #tpu.dot_dimension_numbers<[1], [0], [0], [1], [0, 0, 1, 1], [], []>} : vector<16x16xbf16>, vector<16x64xbf16>, vector<16x64xf32> -> vector<16x64xf32>
    %135 = arith.addf %130, %134 : vector<16x64xf32>
    %136 = vector.extract_strided_slice %94 {offsets = [128, 0], sizes = [16, 16], strides = [1, 1]} : vector<144x16xbf16> to vector<16x16xbf16>
    %c8_86 = arith.constant 8 : index
    %c0_87 = arith.constant 0 : index
    %c0_88 = arith.constant 0 : index
    %137 = vector.load %arg10[%c8_86, %c0_87, %c0_88] : memref<9x16x64xbf16, #tpu.memory_space<vmem>>, vector<1x16x64xbf16>
    %138 = vector.shape_cast %137 : vector<1x16x64xbf16> to vector<16x64xbf16>
    %cst_89 = arith.constant dense<0.000000e+00> : vector<16x64xf32>
    %139 = tpu.matmul %136, %138, %cst_89 {dimension_numbers = #tpu.dot_dimension_numbers<[1], [0], [0], [1], [0, 0, 1, 1], [], []>} : vector<16x16xbf16>, vector<16x64xbf16>, vector<16x64xf32> -> vector<16x64xf32>
    %140 = arith.addf %135, %139 : vector<16x64xf32>
    %c0_90 = arith.constant 0 : index
    %c0_91 = arith.constant 0 : index
    %141 = vector.load %arg11[%c0_90, %c0_91] : memref<16x1xf32, #tpu.memory_space<vmem>>, vector<16x1xf32>
    %142 = vector.broadcast %141 : vector<16x1xf32> to vector<16x64xf32>
    %143 = arith.mulf %140, %142 : vector<16x64xf32>
    %c0_92 = arith.constant 0 : index
    %c0_93 = arith.constant 0 : index
    %144 = vector.load %arg12[%c0_92, %c0_93] : memref<16x1xf32, #tpu.memory_space<vmem>>, vector<16x1xf32>
    %145 = vector.broadcast %144 : vector<16x1xf32> to vector<16x64xf32>
    %146 = arith.addf %143, %145 : vector<16x64xf32>
    %147 = vector.broadcast %90 : f32 to vector<16x64xf32>
    %148 = arith.mulf %147, %146 : vector<16x64xf32>
    %149 = arith.negf %148 : vector<16x64xf32>
    %150 = math.exp %149 : vector<16x64xf32>
    %cst_94 = arith.constant 1.000000e+00 : f32
    %151 = vector.broadcast %cst_94 : f32 to vector<16x64xf32>
    %152 = arith.addf %151, %150 : vector<16x64xf32>
    %153 = arith.divf %151, %152 : vector<16x64xf32>
    %154 = arith.mulf %146, %153 : vector<16x64xf32>
    %c3_95 = arith.constant 3 : index
    %155 = memref.load %arg18[%c3_95] : memref<5xf32, #tpu.memory_space<smem>>
    %c0_96 = arith.constant 0 : index
    %c0_97 = arith.constant 0 : index
    %156 = vector.load %arg13[%c0_96, %c0_97] : memref<72x16xbf16, #tpu.memory_space<vmem>>, vector<72x16xbf16>
    %157 = arith.truncf %154 : vector<16x64xf32> to vector<16x64xbf16>
    %cst_98 = arith.constant dense<0.000000e+00> : vector<72x64xf32>
    %158 = tpu.matmul %156, %157, %cst_98 {dimension_numbers = #tpu.dot_dimension_numbers<[1], [0], [0], [1], [0, 0, 1, 1], [], []>} : vector<72x16xbf16>, vector<16x64xbf16>, vector<72x64xf32> -> vector<72x64xf32>
    %159 = arith.truncf %158 : vector<72x64xf32> to vector<72x64xbf16>
    %cst_99 = arith.constant 0.000000e+00 : f32
    %160 = vector.broadcast %cst_99 : f32 to vector<8x256xf32>
    %161 = vector.extract_strided_slice %159 {offsets = [0, 0], sizes = [8, 64], strides = [1, 1]} : vector<72x64xbf16> to vector<8x64xbf16>
    %c0_100 = arith.constant 0 : index
    %c0_101 = arith.constant 0 : index
    %c0_102 = arith.constant 0 : index
    %162 = vector.load %arg14[%c0_100, %c0_101, %c0_102] : memref<9x64x256xbf16, #tpu.memory_space<vmem>>, vector<1x64x256xbf16>
    %163 = vector.shape_cast %162 : vector<1x64x256xbf16> to vector<64x256xbf16>
    %cst_103 = arith.constant dense<0.000000e+00> : vector<8x256xf32>
    %164 = tpu.matmul %161, %163, %cst_103 {dimension_numbers = #tpu.dot_dimension_numbers<[1], [0], [0], [1], [0, 0, 1, 1], [], []>} : vector<8x64xbf16>, vector<64x256xbf16>, vector<8x256xf32> -> vector<8x256xf32>
    %165 = arith.addf %160, %164 : vector<8x256xf32>
    %166 = vector.extract_strided_slice %159 {offsets = [8, 0], sizes = [8, 64], strides = [1, 1]} : vector<72x64xbf16> to vector<8x64xbf16>
    %c1_104 = arith.constant 1 : index
    %c0_105 = arith.constant 0 : index
    %c0_106 = arith.constant 0 : index
    %167 = vector.load %arg14[%c1_104, %c0_105, %c0_106] : memref<9x64x256xbf16, #tpu.memory_space<vmem>>, vector<1x64x256xbf16>
    %168 = vector.shape_cast %167 : vector<1x64x256xbf16> to vector<64x256xbf16>
    %cst_107 = arith.constant dense<0.000000e+00> : vector<8x256xf32>
    %169 = tpu.matmul %166, %168, %cst_107 {dimension_numbers = #tpu.dot_dimension_numbers<[1], [0], [0], [1], [0, 0, 1, 1], [], []>} : vector<8x64xbf16>, vector<64x256xbf16>, vector<8x256xf32> -> vector<8x256xf32>
    %170 = arith.addf %165, %169 : vector<8x256xf32>
    %171 = vector.extract_strided_slice %159 {offsets = [16, 0], sizes = [8, 64], strides = [1, 1]} : vector<72x64xbf16> to vector<8x64xbf16>
    %c2_108 = arith.constant 2 : index
    %c0_109 = arith.constant 0 : index
    %c0_110 = arith.constant 0 : index
    %172 = vector.load %arg14[%c2_108, %c0_109, %c0_110] : memref<9x64x256xbf16, #tpu.memory_space<vmem>>, vector<1x64x256xbf16>
    %173 = vector.shape_cast %172 : vector<1x64x256xbf16> to vector<64x256xbf16>
    %cst_111 = arith.constant dense<0.000000e+00> : vector<8x256xf32>
    %174 = tpu.matmul %171, %173, %cst_111 {dimension_numbers = #tpu.dot_dimension_numbers<[1], [0], [0], [1], [0, 0, 1, 1], [], []>} : vector<8x64xbf16>, vector<64x256xbf16>, vector<8x256xf32> -> vector<8x256xf32>
    %175 = arith.addf %170, %174 : vector<8x256xf32>
    %176 = vector.extract_strided_slice %159 {offsets = [24, 0], sizes = [8, 64], strides = [1, 1]} : vector<72x64xbf16> to vector<8x64xbf16>
    %c3_112 = arith.constant 3 : index
    %c0_113 = arith.constant 0 : index
    %c0_114 = arith.constant 0 : index
    %177 = vector.load %arg14[%c3_112, %c0_113, %c0_114] : memref<9x64x256xbf16, #tpu.memory_space<vmem>>, vector<1x64x256xbf16>
    %178 = vector.shape_cast %177 : vector<1x64x256xbf16> to vector<64x256xbf16>
    %cst_115 = arith.constant dense<0.000000e+00> : vector<8x256xf32>
    %179 = tpu.matmul %176, %178, %cst_115 {dimension_numbers = #tpu.dot_dimension_numbers<[1], [0], [0], [1], [0, 0, 1, 1], [], []>} : vector<8x64xbf16>, vector<64x256xbf16>, vector<8x256xf32> -> vector<8x256xf32>
    %180 = arith.addf %175, %179 : vector<8x256xf32>
    %181 = vector.extract_strided_slice %159 {offsets = [32, 0], sizes = [8, 64], strides = [1, 1]} : vector<72x64xbf16> to vector<8x64xbf16>
    %c4_116 = arith.constant 4 : index
    %c0_117 = arith.constant 0 : index
    %c0_118 = arith.constant 0 : index
    %182 = vector.load %arg14[%c4_116, %c0_117, %c0_118] : memref<9x64x256xbf16, #tpu.memory_space<vmem>>, vector<1x64x256xbf16>
    %183 = vector.shape_cast %182 : vector<1x64x256xbf16> to vector<64x256xbf16>
    %cst_119 = arith.constant dense<0.000000e+00> : vector<8x256xf32>
    %184 = tpu.matmul %181, %183, %cst_119 {dimension_numbers = #tpu.dot_dimension_numbers<[1], [0], [0], [1], [0, 0, 1, 1], [], []>} : vector<8x64xbf16>, vector<64x256xbf16>, vector<8x256xf32> -> vector<8x256xf32>
    %185 = arith.addf %180, %184 : vector<8x256xf32>
    %186 = vector.extract_strided_slice %159 {offsets = [40, 0], sizes = [8, 64], strides = [1, 1]} : vector<72x64xbf16> to vector<8x64xbf16>
    %c5_120 = arith.constant 5 : index
    %c0_121 = arith.constant 0 : index
    %c0_122 = arith.constant 0 : index
    %187 = vector.load %arg14[%c5_120, %c0_121, %c0_122] : memref<9x64x256xbf16, #tpu.memory_space<vmem>>, vector<1x64x256xbf16>
    %188 = vector.shape_cast %187 : vector<1x64x256xbf16> to vector<64x256xbf16>
    %cst_123 = arith.constant dense<0.000000e+00> : vector<8x256xf32>
    %189 = tpu.matmul %186, %188, %cst_123 {dimension_numbers = #tpu.dot_dimension_numbers<[1], [0], [0], [1], [0, 0, 1, 1], [], []>} : vector<8x64xbf16>, vector<64x256xbf16>, vector<8x256xf32> -> vector<8x256xf32>
    %190 = arith.addf %185, %189 : vector<8x256xf32>
    %191 = vector.extract_strided_slice %159 {offsets = [48, 0], sizes = [8, 64], strides = [1, 1]} : vector<72x64xbf16> to vector<8x64xbf16>
    %c6_124 = arith.constant 6 : index
    %c0_125 = arith.constant 0 : index
    %c0_126 = arith.constant 0 : index
    %192 = vector.load %arg14[%c6_124, %c0_125, %c0_126] : memref<9x64x256xbf16, #tpu.memory_space<vmem>>, vector<1x64x256xbf16>
    %193 = vector.shape_cast %192 : vector<1x64x256xbf16> to vector<64x256xbf16>
    %cst_127 = arith.constant dense<0.000000e+00> : vector<8x256xf32>
    %194 = tpu.matmul %191, %193, %cst_127 {dimension_numbers = #tpu.dot_dimension_numbers<[1], [0], [0], [1], [0, 0, 1, 1], [], []>} : vector<8x64xbf16>, vector<64x256xbf16>, vector<8x256xf32> -> vector<8x256xf32>
    %195 = arith.addf %190, %194 : vector<8x256xf32>
    %196 = vector.extract_strided_slice %159 {offsets = [56, 0], sizes = [8, 64], strides = [1, 1]} : vector<72x64xbf16> to vector<8x64xbf16>
    %c7_128 = arith.constant 7 : index
    %c0_129 = arith.constant 0 : index
    %c0_130 = arith.constant 0 : index
    %197 = vector.load %arg14[%c7_128, %c0_129, %c0_130] : memref<9x64x256xbf16, #tpu.memory_space<vmem>>, vector<1x64x256xbf16>
    %198 = vector.shape_cast %197 : vector<1x64x256xbf16> to vector<64x256xbf16>
    %cst_131 = arith.constant dense<0.000000e+00> : vector<8x256xf32>
    %199 = tpu.matmul %196, %198, %cst_131 {dimension_numbers = #tpu.dot_dimension_numbers<[1], [0], [0], [1], [0, 0, 1, 1], [], []>} : vector<8x64xbf16>, vector<64x256xbf16>, vector<8x256xf32> -> vector<8x256xf32>
    %200 = arith.addf %195, %199 : vector<8x256xf32>
    %201 = vector.extract_strided_slice %159 {offsets = [64, 0], sizes = [8, 64], strides = [1, 1]} : vector<72x64xbf16> to vector<8x64xbf16>
    %c8_132 = arith.constant 8 : index
    %c0_133 = arith.constant 0 : index
    %c0_134 = arith.constant 0 : index
    %202 = vector.load %arg14[%c8_132, %c0_133, %c0_134] : memref<9x64x256xbf16, #tpu.memory_space<vmem>>, vector<1x64x256xbf16>
    %203 = vector.shape_cast %202 : vector<1x64x256xbf16> to vector<64x256xbf16>
    %cst_135 = arith.constant dense<0.000000e+00> : vector<8x256xf32>
    %204 = tpu.matmul %201, %203, %cst_135 {dimension_numbers = #tpu.dot_dimension_numbers<[1], [0], [0], [1], [0, 0, 1, 1], [], []>} : vector<8x64xbf16>, vector<64x256xbf16>, vector<8x256xf32> -> vector<8x256xf32>
    %205 = arith.addf %200, %204 : vector<8x256xf32>
    %c0_136 = arith.constant 0 : index
    %c0_137 = arith.constant 0 : index
    %206 = vector.load %arg15[%c0_136, %c0_137] : memref<8x1xf32, #tpu.memory_space<vmem>>, vector<8x1xf32>
    %207 = vector.broadcast %206 : vector<8x1xf32> to vector<8x256xf32>
    %208 = arith.mulf %205, %207 : vector<8x256xf32>
    %c0_138 = arith.constant 0 : index
    %c0_139 = arith.constant 0 : index
    %209 = vector.load %arg16[%c0_138, %c0_139] : memref<8x1xf32, #tpu.memory_space<vmem>>, vector<8x1xf32>
    %210 = vector.broadcast %209 : vector<8x1xf32> to vector<8x256xf32>
    %211 = arith.addf %208, %210 : vector<8x256xf32>
    %212 = vector.broadcast %155 : f32 to vector<8x256xf32>
    %213 = arith.mulf %212, %211 : vector<8x256xf32>
    %214 = arith.negf %213 : vector<8x256xf32>
    %215 = math.exp %214 : vector<8x256xf32>
    %cst_140 = arith.constant 1.000000e+00 : f32
    %216 = vector.broadcast %cst_140 : f32 to vector<8x256xf32>
    %217 = arith.addf %216, %215 : vector<8x256xf32>
    %218 = arith.divf %216, %217 : vector<8x256xf32>
    %219 = arith.mulf %211, %218 : vector<8x256xf32>
    %c0_141 = arith.constant 0 : index
    %c0_142 = arith.constant 0 : index
    %220 = vector.load %arg17[%c0_141, %c0_142] : memref<1x8xbf16, #tpu.memory_space<vmem>>, vector<1x8xbf16>
    %221 = arith.truncf %219 : vector<8x256xf32> to vector<8x256xbf16>
    %cst_143 = arith.constant dense<0.000000e+00> : vector<1x256xf32>
    %222 = tpu.matmul %220, %221, %cst_143 {dimension_numbers = #tpu.dot_dimension_numbers<[1], [0], [0], [1], [0, 0, 1, 1], [], []>} : vector<1x8xbf16>, vector<8x256xbf16>, vector<1x256xf32> -> vector<1x256xf32>
    %c4_144 = arith.constant 4 : index
    %223 = memref.load %arg18[%c4_144] : memref<5xf32, #tpu.memory_space<smem>>
    %224 = vector.broadcast %223 : f32 to vector<1x256xf32>
    %225 = arith.addf %222, %224 : vector<1x256xf32>
    %c0_145 = arith.constant 0 : index
    %c0_146 = arith.constant 0 : index
    %c0_147 = arith.constant 0 : index
    %226 = vector.load %arg19[%c0_145, %c0_146, %c0_147] : memref<1x1x256xf32, #tpu.memory_space<vmem>>, vector<1x1x256xf32>
    %227 = vector.shape_cast %226 : vector<1x1x256xf32> to vector<1x256xf32>
    %228 = vector.shape_cast %225 : vector<1x256xf32> to vector<1x1x256xf32>
    tpu.vector_store %arg19[%c0_145, %c0_146, %c0_147], %228 {strides = array<i32>} : memref<1x1x256xf32, #tpu.memory_space<vmem>>, vector<1x1x256xf32>,
    return
  }
  func.func @transform_0(%arg0: i32) -> (i32, i32, i32) {
    %c0_i32 = arith.constant 0 : i32
    %c0_i32_0 = arith.constant 0 : i32
    %c0_i32_1 = arith.constant 0 : i32
    return %arg0, %c0_i32, %c0_i32_0 : i32, i32, i32
  }
  func.func @transform_1(%arg0: i32) -> (i32, i32, i32) {
    %c0_i32 = arith.constant 0 : i32
    %c0_i32_0 = arith.constant 0 : i32
    %c0_i32_1 = arith.constant 0 : i32
    return %arg0, %c0_i32, %c0_i32_0 : i32, i32, i32
  }
  func.func @transform_2(%arg0: i32) -> (i32, i32) {
    %c0_i32 = arith.constant 0 : i32
    %c0_i32_0 = arith.constant 0 : i32
    %c0_i32_1 = arith.constant 0 : i32
    return %c0_i32, %c0_i32_0 : i32, i32
  }
  func.func @transform_3(%arg0: i32) -> (i32, i32) {
    %c0_i32 = arith.constant 0 : i32
    %c0_i32_0 = arith.constant 0 : i32
    %c0_i32_1 = arith.constant 0 : i32
    return %c0_i32, %c0_i32_0 : i32, i32
  }
  func.func @transform_4(%arg0: i32) -> (i32, i32) {
    %c0_i32 = arith.constant 0 : i32
    %c0_i32_0 = arith.constant 0 : i32
    %c0_i32_1 = arith.constant 0 : i32
    return %c0_i32, %c0_i32_0 : i32, i32
  }
  func.func @transform_5(%arg0: i32) -> (i32, i32, i32) {
    %c0_i32 = arith.constant 0 : i32
    %c0_i32_0 = arith.constant 0 : i32
    %c0_i32_1 = arith.constant 0 : i32
    %c0_i32_2 = arith.constant 0 : i32
    return %c0_i32, %c0_i32_0, %c0_i32_1 : i32, i32, i32
  }
  func.func @transform_6(%arg0: i32) -> (i32, i32) {
    %c0_i32 = arith.constant 0 : i32
    %c0_i32_0 = arith.constant 0 : i32
    %c0_i32_1 = arith.constant 0 : i32
    return %c0_i32, %c0_i32_0 : i32, i32
  }
  func.func @transform_7(%arg0: i32) -> (i32, i32) {
    %c0_i32 = arith.constant 0 : i32
    %c0_i32_0 = arith.constant 0 : i32
    %c0_i32_1 = arith.constant 0 : i32
    return %c0_i32, %c0_i32_0 : i32, i32
  }
  func.func @transform_8(%arg0: i32) -> (i32, i32) {
    %c0_i32 = arith.constant 0 : i32
    %c0_i32_0 = arith.constant 0 : i32
    %c0_i32_1 = arith.constant 0 : i32
    return %c0_i32, %c0_i32_0 : i32, i32
  }
  func.func @transform_9(%arg0: i32) -> (i32, i32, i32) {
    %c0_i32 = arith.constant 0 : i32
    %c0_i32_0 = arith.constant 0 : i32
    %c0_i32_1 = arith.constant 0 : i32
    %c0_i32_2 = arith.constant 0 : i32
    return %c0_i32, %c0_i32_0, %c0_i32_1 : i32, i32, i32
  }
  func.func @transform_10(%arg0: i32) -> (i32, i32) {
    %c0_i32 = arith.constant 0 : i32
    %c0_i32_0 = arith.constant 0 : i32
    %c0_i32_1 = arith.constant 0 : i32
    return %c0_i32, %c0_i32_0 : i32, i32
  }
  func.func @transform_11(%arg0: i32) -> (i32, i32) {
    %c0_i32 = arith.constant 0 : i32
    %c0_i32_0 = arith.constant 0 : i32
    %c0_i32_1 = arith.constant 0 : i32
    return %c0_i32, %c0_i32_0 : i32, i32
  }
  func.func @transform_12(%arg0: i32) -> (i32, i32) {
    %c0_i32 = arith.constant 0 : i32
    %c0_i32_0 = arith.constant 0 : i32
    %c0_i32_1 = arith.constant 0 : i32
    return %c0_i32, %c0_i32_0 : i32, i32
  }
  func.func @transform_13(%arg0: i32) -> (i32, i32, i32) {
    %c0_i32 = arith.constant 0 : i32
    %c0_i32_0 = arith.constant 0 : i32
    %c0_i32_1 = arith.constant 0 : i32
    %c0_i32_2 = arith.constant 0 : i32
    return %c0_i32, %c0_i32_0, %c0_i32_1 : i32, i32, i32
  }
  func.func @transform_14(%arg0: i32) -> (i32, i32) {
    %c0_i32 = arith.constant 0 : i32
    %c0_i32_0 = arith.constant 0 : i32
    %c0_i32_1 = arith.constant 0 : i32
    return %c0_i32, %c0_i32_0 : i32, i32
  }
  func.func @transform_15(%arg0: i32) -> (i32, i32) {
    %c0_i32 = arith.constant 0 : i32
    %c0_i32_0 = arith.constant 0 : i32
    %c0_i32_1 = arith.constant 0 : i32
    return %c0_i32, %c0_i32_0 : i32, i32
  }
  func.func @transform_16(%arg0: i32) -> (i32, i32) {
    %c0_i32 = arith.constant 0 : i32
    %c0_i32_0 = arith.constant 0 : i32
    %c0_i32_1 = arith.constant 0 : i32
    return %c0_i32, %c0_i32_0 : i32, i32
  }
  func.func @transform_17(%arg0: i32) -> i32 {
    %c0_i32 = arith.constant 0 : i32
    %c0_i32_0 = arith.constant 0 : i32
    return %c0_i32 : i32
  }
  func.func @transform_18(%arg0: i32) -> (i32, i32, i32) {
    %c0_i32 = arith.constant 0 : i32
    %c0_i32_0 = arith.constant 0 : i32
    %c0_i32_1 = arith.constant 0 : i32
    return %arg0, %c0_i32, %c0_i32_0 : i32, i32, i32
  }
}

</mosaic_0001>

<bundles_post_ra>
// kernel: tpu_custom_call.1
= control target key start
LH: loop header
LB: loop body
LE: loop exit
PB: predicated region body
PF: predicated region fallthrough
CT: control target
= control target key end

     0   :  { %s5939_s0 = inlined_call_operand.hbm [shape: f32[2,1,32], index: 0, kind: input, shape index: {}]   ;;  %s5940_s1 = inlined_call_operand.hbm [shape: f32[2,1,32], index: 1, kind: input, shape index: {}]   ;;  %s5941_s2 = inlined_call_operand.vmem [shape: bf16[32,512], index: 2, kind: input, shape index: {}]   ;;  %s5942_s3 = inlined_call_operand.hbm [shape: f32[1,512], index: 3, kind: input, shape index: {}]   ;;  %s5943_s4 = inlined_call_operand.vmem [shape: bf16[288,128], index: 4, kind: input, shape index: {}]   ;;  %s5944_s5 = inlined_call_operand.hbm [shape: bf16[9,4,16], index: 5, kind: input, shape index: {}]   ;;  %s5945_s6 = inlined_call_operand.vmem [shape: f32[32,1], index: 6, kind: input, shape index: {}]   ;;  %s5946_s7 = inlined_call_operand.vmem [shape: f32[32,1], index: 7, kind: input, shape index: {}]   ;;  %s5947_s8 = inlined_call_operand.vmem [shape: bf16[144,32], index: 8, kind: input, shape index: {}]   ;;  %s5948_s9 = inlined_call_operand.vmem [shape: bf16[9,16,64], index: 9, kind: input, shape index: {}]   ;;  %s5949_s10 = inlined_call_operand.vmem [shape: f32[16,1], index: 10, kind: input, shape index: {}]   ;;  %s5950_s11 = inlined_call_operand.vmem [shape: f32[16,1], index: 11, kind: input, shape index: {}]   ;;  %s5951_s12 = inlined_call_operand.vmem [shape: bf16[72,16], index: 12, kind: input, shape index: {}]   ;;  %s5952_s13 = inlined_call_operand.hbm [shape: bf16[9,64,256], index: 13, kind: input, shape index: {}]   ;;  %s5953_s14 = inlined_call_operand.vmem [shape: f32[8,1], index: 14, kind: input, shape index: {}]   ;;  %s5954_s15 = inlined_call_operand.vmem [shape: f32[8,1], index: 15, kind: input, shape index: {}]   ;;  %s5955_s16 = inlined_call_operand.vmem [shape: bf16[1,8], index: 16, kind: input, shape index: {}]   ;;  %s5956_s17 = inlined_call_operand.vmem [shape: f32[5], index: 17, kind: input, shape index: {}]   ;;  %s5957_s18 = inlined_call_operand.hbm [shape: f32[2,1,256], index: 18, kind: output, shape index: {}]  }
   0x1   :  { %5971 = sst [smem:[#allocation21_spill]] %s5939_s0 }
   0x2   :  { %5972 = sst [smem:[#allocation22_spill]] %s5940_s1 }
   0x3   :  { %5973 = sst [smem:[#allocation23_spill]] %s5941_s2 }
   0x4   :  { %5974 = sst [smem:[#allocation24_spill]] %s5942_s3 }
   0x5   :  { %5975 = sst [smem:[#allocation25_spill]] %s5944_s5 }
   0x6   :  { %5976 = sst [smem:[#allocation26_spill]] %s5947_s8 }
   0x7   :  { %5977 = sst [smem:[#allocation27_spill]] %s5948_s9 }
   0x8   :  { %5978 = sst [smem:[#allocation28_spill]] %s5950_s11 }
   0x9   :  { %5979 = sst [smem:[#allocation29_spill]] %s5951_s12 }
   0xa   :  { %5980 = sst [smem:[#allocation30_spill]] %s5952_s13 }
   0xb   :  { %5981 = sst [smem:[#allocation31_spill]] %s5953_s14 }
   0xc   :  { %5982 = sst [smem:[#allocation32_spill]] %s5954_s15 }
   0xd   :  { %5983 = sst [smem:[#allocation33_spill]] %s5955_s16 }
   0xe   :  { %5984 = sst [smem:[#allocation34_spill]] %s5956_s17 }
   0xf   :  { %5985 = sst [smem:[#allocation35_spill]] %s5957_s18 }
  0x10   :  { %23 = vsyncpa [#allocation3], 0 }
  0x11   :  { %25 = vsyncpa [#allocation3 + $0x1], 0 }
  0x12   :  { %26 = vsyncpa [#allocation7], 0 }
  0x13   :  { %28 = vsyncpa [#allocation7 + $0x1], 0 }
  0x14   :  { %29 = vsyncpa [#allocation10], 0 }
  0x15   :  { %30 = vsyncpa [#allocation5], 0 }
  0x16   :  { %31 = vsyncpa [#allocation4], 0 }
  0x17   :  { %33 = vsyncpa [#allocation4 + $0x1], 0  ;;  %s5230_s27 = smov 0   ;;  %s5232_s28 = smov 0  }
  0x18   :  { %s5234_s29 = smov 0   ;;  %s5236_s30 = smov 0  }
  0x19 LB: > { %s5120_s0 = smov [#allocation8]   ;;  %s5251_s1 = sadd.s32 4294967295, %s5118_s30   ;;  %s5118_s30 = sphi %s5236_s30, %s6026_s30   ;;  %s5114_s29 = sphi %s5234_s29, %s6025_s29   ;;  %s5110_s28 = sphi %s5232_s28, %s6024_s28   ;;  %s5106_s27 = sphi %s5230_s27, %s6023_s27  }
  0x1a   : > { %s474_s19 = sshll.u32 %s5120_s0, 4  ;;  %p3908_p0 = scmp.ge.s32.totalorder %s5118_s30, 1  ;;  %s475_s19 = int_to_ptr.vmem [resolvable:$true] %s474_s19 }
  0x1b   : > { %p5963_p1 = scmp.eq.s32.totalorder %s5251_s1, 0  ;;  %p458_p2 = scmp.lt.s32.totalorder %s5118_s30, 3 }
  0x1c   : > { %s5121_s21 = smov [#allocation9]   ;;  %s5122_s23 = smov [#allocation11]  }
  0x1d   : > { %p5256_p3 = pnand %p3908_p0, %p458_p2  ;;  %s487_s22 = sshll.u32 %s5121_s21, 4  ;;  %s5263_s22 = int_to_ptr.vmem [resolvable:$true] %s487_s22 }
  0x1e   : > { %s521_s24 = sshll.u32 %s5122_s23, 4  ;;  %s5988_s3 = sld [smem:[#allocation24_spill]]  ;;  %s5271_s24 = int_to_ptr.vmem [resolvable:$true] %s521_s24 }
  0x1f   : > { %s5986_s20 = scalar_select %p5256_p3, 1, 0 }
  0x20   : > { %p4588_p5 = pneg %p5256_p3 }
  0x22   : > { %p5267_p6 = pnand %p4588_p5, %p5963_p1 }
  0x24   : > { %s4877_s0 = scalar_lea.hbm %s5988_s3, 64  ;;  %p5281_p8 = pneg %p5267_p6 }
  0x25   : > { %p4878_p7 = scmp.ne.s32.totalorder %s5988_s3, %s4877_s0  ;;  %p4884_p11 = scmp.lt.u32.totalorder %s4877_s0, %s5988_s3 }
  0x27   : > { %p4880_p9 = pnand %p5281_p8, %p4878_p7 }
  0x29   : > { %p4881_p10 = pneg %p4880_p9 }
  0x2b   : > { %p4886_p12 = pnand %p4884_p11, %p4881_p10 }
  0x2d   : > { %4889 = shalt.err (!%p4886_p12)
}
  0x2e   : > { %s4890_s25 = scalar_lea.vmem %s475_s19, 64  ;;  %p4898_p5 = scmp.lt.s32.totalorder %s475_s19, %s475_s19 }
  0x2f   : > { %p4891_p13 = scmp.ne.s32.totalorder %s475_s19, %s4890_s25  ;;  %p4899_p4 = scmp.lt.s32.totalorder %s4890_s25, %s4890_s25 }
  0x31   : > { %p4893_p0 = pnand %p4891_p13, %p5281_p8  ;;  %p4900_p1 = por %p4899_p4, %p4898_p5 }
  0x33   : > { %p4894_p2 = pneg %p4893_p0 }
  0x35   : > { %p4901_p3 = pnand %p4900_p1, %p4894_p2 }
  0x37   : > { %4904 = shalt.err (!%p4901_p3)
}
  0x38   : > { %4591 = dma.hbm_to_vmem [thread:$0]  (!%p5267_p6), %s5988_s3, 64, %s475_s19, [#allocation7]  }
  0x39   : > { %s5990_s5 = sld [smem:[#allocation25_spill]] }
  0x3f   : > { %s4905_s0 = scalar_lea.hbm %s5990_s5, 288 }
  0x40   : > { %p4906_p7 = scmp.ne.s32.totalorder %s5990_s5, %s4905_s0  ;;  %p4912_p1 = scmp.lt.u32.totalorder %s4905_s0, %s5990_s5 }
  0x42   : > { %p4908_p9 = pnand %p4906_p7, %p5281_p8 }
  0x44   : > { %p4909_p4 = pneg %p4908_p9 }
  0x46   : > { %p4914_p3 = pnand %p4912_p1, %p4909_p4 }
  0x48   : > { %4917 = shalt.err (!%p4914_p3)
}
  0x49   : > { %s4918_s19 = scalar_lea.vmem %s5263_s22, 288  ;;  %p4926_p13 = scmp.lt.s32.totalorder %s5263_s22, %s5263_s22 }
  0x4a   : > { %p4919_p10 = scmp.ne.s32.totalorder %s5263_s22, %s4918_s19  ;;  %p4927_p0 = scmp.lt.s32.totalorder %s4918_s19, %s4918_s19 }
  0x4c   : > { %p4921_p11 = pnand %p4919_p10, %p5281_p8  ;;  %p4928_p2 = por %p4927_p0, %p4926_p13 }
  0x4e   : > { %p4922_p12 = pneg %p4921_p11 }
  0x50   : > { %p4929_p5 = pnand %p4928_p2, %p4922_p12 }
  0x52   : > { %4932 = shalt.err (!%p4929_p5)
}
  0x53   : > { %s5123_s9 = smov 32   ;;  %s5124_s8 = smov 2  }
  0x54   : > { %4594 = dma.hbm_to_vmem [thread:$0]  (!%p5267_p6), %s5990_s5, 288, %s5263_s22, [#allocation10], %s5123_s9, %s5123_s9, %s5124_s8  }
  0x55   : > { %s5991_s17 = sld [smem:[#allocation34_spill]]  ;;  %s5992_s13 = sld [smem:[#allocation30_spill]] }
  0x5b   : > { %s544_s0 = sshll.u32 %s5991_s17, 4  ;;  %s4933_s19 = scalar_lea.hbm %s5992_s13, 9216  ;;  %s545_s0 = int_to_ptr.vmem [resolvable:$true] %s544_s0 }
  0x5c   : > { %p4934_p7 = scmp.ne.s32.totalorder %s5992_s13, %s4933_s19  ;;  %p4940_p1 = scmp.lt.u32.totalorder %s4933_s19, %s5992_s13 }
  0x5e   : > { %p4936_p9 = pnand %p4934_p7, %p5281_p8 }
  0x60   : > { %p4937_p4 = pneg %p4936_p9 }
  0x62   : > { %p4942_p3 = pnand %p4940_p1, %p4937_p4 }
  0x64   : > { %4945 = shalt.err (!%p4942_p3)
}
  0x65   : > { %s4946_s22 = scalar_lea.vmem %s5271_s24, 9216  ;;  %p4954_p13 = scmp.lt.s32.totalorder %s5271_s24, %s5271_s24 }
  0x66   : > { %p4947_p10 = scmp.ne.s32.totalorder %s5271_s24, %s4946_s22  ;;  %p4955_p0 = scmp.lt.s32.totalorder %s4946_s22, %s4946_s22 }
  0x68   : > { %p4949_p11 = pnand %p4947_p10, %p5281_p8  ;;  %p4956_p2 = por %p4955_p0, %p4954_p13 }
  0x6a   : > { %p4950_p12 = pneg %p4949_p11 }
  0x6c   : > { %p4957_p5 = pnand %p4956_p2, %p4950_p12 }
  0x6e   : > { %4960 = shalt.err (!%p4957_p5)
}
  0x6f   : > { %s5125_s3 = smov 128   ;;  %s5126_s11 = smov 8  }
  0x70   : > { %4597 = dma.hbm_to_vmem [thread:$0]  (!%p5267_p6), %s5992_s13, 9216, %s5271_s24, [#allocation10], %s5125_s3, %s5125_s3, %s5126_s11  }
  0x71   : > { %s4961_s9 = scalar_lea.vmem %s545_s0, 16  ;;  %p4969_p1 = scmp.lt.s32.totalorder %s545_s0, %s545_s0 }
  0x72   : > { %p4962_p7 = scmp.ne.s32.totalorder %s545_s0, %s4961_s9  ;;  %p4970_p3 = scmp.lt.s32.totalorder %s4961_s9, %s4961_s9 }
  0x74   : > { %p4964_p9 = pnand %p4962_p7, %p5281_p8  ;;  %p4971_p10 = por %p4970_p3, %p4969_p1 }
  0x76   : > { %p4965_p4 = pneg %p4964_p9 }
  0x78   : > { %p4972_p11 = pnand %p4971_p10, %p4965_p4 }
  0x7a   : > { %4975 = shalt.err (!%p4972_p11)
}
  0x7b   : > { %s5127_s8 = smov [#allocation12]   ;;  %s3907_s24 = sadd.s32 4294967294, %s5118_s30  }
  0x7c   : > { %4600 = dma.vmem_to_smem (!%p5267_p6), %s545_s0, 16, %s5127_s8, [#allocation5]  }
  0x7d   : > { %s5352_s21 = sadd.s32 1, %s5118_s30   ;;  %s46_s16 = sadd.s32 1, %s5114_s29 }
  0x7e   : > { %s43_s2 = ssub.s32 %s5118_s30, %s5352_s21  ;;  %p53_p12 = scmp.ne.s32.totalorder %s5114_s29, %s5110_s28 }
  0x7f   : > { %p44_p8 = scmp.eq.s32.totalorder %s43_s2, 0  ;;  %p54_p13 = scmp.eq.s32.totalorder %s5118_s30, 0 }
  0x80   : > { %p59_p0 = scmp.ne.s32.totalorder %s5110_s28, %s5106_s27  ;;  %p5995_p5 = scmp.eq.s32.totalorder %s5251_s1, 0 }
  0x81   : > { %s5363_s18 = scalar_select %p44_p8, %s5114_s29, %s46_s16  }
  0x82   : > { %p5365_p2 = por %p54_p13, %p53_p12  ;;  %p5371_p6 = por %p5995_p5, %p59_p0 }
  0x83   : > { %5993 = sst [smem:[#allocation20_spill]] %s5363_s18  ;;  %p445_p7 = scmp.eq.s32.totalorder %s5251_s1, 1 }
  0x84   : > { %s5996_s26 = scalar_select %p5371_p6, 1, 0 }
  0x85   : > { %p451_p9 = scmp.eq.s32.totalorder %s3907_s24, 1  ;;  %p4616_p4 = scmp.lt.s32.totalorder %s5118_s30, 2 }
  0x86   : > { %s5378_s0 = sand.u32 1, %s5114_s29   ;;  %p5380_p1 = por %p445_p7, %p53_p12 }
  0x87   : > { %p5384_p3 = por %p451_p9, %p59_p0  ;;  %s3914_s19 = sshll.u32 %s5118_s30, 4 }
  0x88   : > { %s5997_s23 = scalar_select %p5380_p1, 1, 0 }
  0x89   : > { %s5998_s25 = scalar_select %p5384_p3, 1, 0 }
  0x8a   : > { %s558_s22 = scalar_lea.vmem [#allocation2], %s5378_s0  ;;  %s5999_s15 = sld [smem:[#allocation21_spill]] }
  0x8b   : > { %s565_s3 = sshll.u32 %s558_s22, 4  ;;  %p5399_p10 = pnand %p4616_p4, %p5365_p2  ;;  %s5395_s3 = int_to_ptr.vmem [resolvable:$true] %s565_s3 }
  0x8c   : > { %s6001_s16 = sld [smem:[#allocation22_spill]]  ;;  %s572_s11 = sand.u32 1, %s5118_s30  }
  0x8d   : > { %s556_s14 = scalar_lea.sflag [#allocation3], %s5378_s0  ;;  %p4978_p8 = pneg %p5399_p10 }
  0x90   : > { %s5393_s9 = scalar_lea.hbm %s5999_s15, %s3914_s19  ;;  %s4981_s17 = scalar_lea.hbm %s5999_s15, 32 }
  0x91   : > { %s4976_s5 = scalar_lea.hbm %s5393_s9, 16  ;;  %p4982_p0 = scmp.lt.u32.totalorder %s5393_s9, %s5999_s15 }
  0x92   : > { %s5406_s22 = scalar_lea.hbm %s6001_s16, %s3914_s19  ;;  %p4977_p11 = scmp.ne.s32.totalorder %s5393_s9, %s4976_s5 }
  0x93   : > { %p4983_p2 = scmp.lt.u32.totalorder %s4981_s17, %s4976_s5  ;;  %p4985_p7 = scmp.lt.u32.totalorder %s4976_s5, %s5393_s9 }
  0x94   : > { %p4979_p12 = pnand %p4978_p8, %p4977_p11 }
  0x95   : > { %p4984_p5 = por %p4983_p2, %p4982_p0 }
  0x96   : > { %p4980_p13 = pneg %p4979_p12 }
  0x97   : > { %p4986_p9 = por %p4985_p7, %p4984_p5 }
  0x99   : > { %p4987_p4 = pnand %p4986_p9, %p4980_p13 }
  0x9b   : > { %4990 = shalt.err (!%p4987_p4)
}
  0x9c   : > { %s4991_s19 = scalar_lea.vmem %s5395_s3, 16  ;;  %s5128_s13 = smov [#allocation2]  }
  0x9d   : > { %p4992_p11 = scmp.ne.s32.totalorder %s5395_s3, %s4991_s19  ;;  %s4996_s2 = sshll.u32 %s5128_s13, 4  ;;  %s4997_s2 = int_to_ptr.vmem [resolvable:$false] %s4996_s2 }
  0x9e   : > { %s4998_s18 = scalar_lea.vmem %s4997_s2, 32  ;;  %p4999_p1 = scmp.lt.s32.totalorder %s5395_s3, %s4997_s2 }
  0x9f   : > { %p4994_p12 = pnand %p4992_p11, %p4978_p8  ;;  %p5000_p0 = scmp.lt.s32.totalorder %s4998_s18, %s4991_s19 }
  0xa1   : > { %p4995_p3 = pneg %p4994_p12  ;;  %p5001_p2 = por %p5000_p0, %p4999_p1 }
  0xa3   : > { %p5002_p5 = pnand %p5001_p2, %p4995_p3 }
  0xa5   : > { %5005 = shalt.err (!%p5002_p5)
}
  0xa6   : > { %4604 = dma.hbm_to_vmem [thread:$0]  (!%p5399_p10), %s5393_s9, 16, %s5395_s3, %s556_s14  }
  0xa7   : > { %s575_s5 = scalar_lea.vmem [#allocation6], %s5378_s0  ;;  %s573_s12 = scalar_lea.sflag [#allocation7], %s572_s11 }
  0xa8   : > { %s582_s17 = sshll.u32 %s575_s5, 4  ;;  %s5006_s24 = scalar_lea.hbm %s5406_s22, 16  ;;  %s583_s17 = int_to_ptr.vmem [resolvable:$true] %s582_s17 }
  0xa9   : > { %p5007_p1 = scmp.ne.s32.totalorder %s5406_s22, %s5006_s24  ;;  %s5011_s2 = scalar_lea.hbm %s6001_s16, 32 }
  0xaa   : > { %p5012_p7 = scmp.lt.u32.totalorder %s5406_s22, %s6001_s16  ;;  %p5013_p9 = scmp.lt.u32.totalorder %s5011_s2, %s5006_s24 }
  0xab   : > { %p5009_p3 = pnand %p5007_p1, %p4978_p8  ;;  %p5015_p11 = scmp.lt.u32.totalorder %s5006_s24, %s5406_s22 }
  0xac   : > { %p5014_p4 = por %p5013_p9, %p5012_p7 }
  0xad   : > { %p5010_p13 = pneg %p5009_p3 }
  0xae   : > { %p5016_p12 = por %p5015_p11, %p5014_p4 }
  0xb0   : > { %p5017_p0 = pnand %p5016_p12, %p5010_p13 }
  0xb2   : > { %5020 = shalt.err (!%p5017_p0)
}
  0xb3   : > { %s5021_s0 = scalar_lea.vmem %s583_s17, 16  ;;  %s5129_s3 = smov [#allocation6]  }
  0xb4   : > { %p5022_p2 = scmp.ne.s32.totalorder %s583_s17, %s5021_s0  ;;  %s5026_s9 = sshll.u32 %s5129_s3, 4  ;;  %s5027_s9 = int_to_ptr.vmem [resolvable:$false] %s5026_s9 }
  0xb5   : > { %s5028_s11 = scalar_lea.vmem %s5027_s9, 32  ;;  %p5029_p3 = scmp.lt.s32.totalorder %s583_s17, %s5027_s9 }
  0xb6   : > { %p5024_p5 = pnand %p5022_p2, %p4978_p8  ;;  %p5030_p6 = scmp.lt.s32.totalorder %s5028_s11, %s5021_s0 }
  0xb8   : > { %p5025_p1 = pneg %p5024_p5  ;;  %p5031_p7 = por %p5030_p6, %p5029_p3 }
  0xba   : > { %p5032_p9 = pnand %p5031_p7, %p5025_p1 }
  0xbc   : > { %5035 = shalt.err (!%p5032_p9)
}
  0xbd   : > { %4607 = dma.hbm_to_vmem [thread:$0]  (!%p5399_p10), %s5406_s22, 16, %s583_s17, %s573_s12  }
  0xbe   : > { %p6002_p13 = scmp.ne.s32.totalorder %s5986_s20, 0 }
  0xbf   : > { %s5460_s15 = sand.u32 (!%p6002_p13), 1, %s5110_s28   ;;  %p6003_p8 = scmp.ne.s32.totalorder (!%p6002_p13), %s5996_s26, 0 }
  0xc0   : > { %591 = sbr.rel (%p6002_p13) target bundleno = 2663 (0xa67), region = 92  ;;  %s594_s14 = scalar_lea.sflag (!%p6002_p13), [#allocation3], %s5460_s15 }
  0xc1   : > { %s596_s5 = scalar_lea.vmem (!%p6002_p13), [#allocation2], %s5460_s15 }
  0xc7   : > { %5081 = dma.done.wait (%p6003_p8), %s594_s14, 16  }
  0xc8   : > { %5083 = vsyncadd (%p6003_p8), %s594_s14, 4294967280  ;;  %s601_s8 = sand.u32 1, %s5251_s1   ;;  %s604_s20 = scalar_lea.vmem [#allocation6], %s5460_s15 }
  0xc9   : > { %s602_s22 = scalar_lea.sflag [#allocation7], %s601_s8 }
  0xca   : > { %5085 = dma.done.wait (%p6003_p8), %s602_s22, 16  }
  0xcb   : > { %5087 = vsyncadd (%p6003_p8), %s602_s22, 4294967280  ;;  %p6004_p6 = scmp.eq.s32.totalorder %s5251_s1, 0 }
  0xcd   : > { %5089 = dma.done.wait (%p6004_p6), [#allocation7], 64   ;;  %p6005_p10 = pmov %p6004_p6 }
  0xce   : > { %p6006_p4 = pmov %p6004_p6 }
  0xcf   : > { %5091 = vsyncadd (%p6005_p10), [#allocation7], 4294967232 }
  0xd0   : > { %5093 = dma.done.wait (%p6006_p4), [#allocation10], 9504   ;;  %p6007_p11 = pmov %p6006_p4 }
  0xd1   : > { %p6008_p12 = pmov %p6006_p4 }
  0xd2   : > { %5095 = vsyncadd (%p6007_p11), [#allocation10], 4294957792 }
  0xd3   : > { %5097 = dma.done.wait (%p6008_p12), [#allocation5], 16   ;;  %p6009_p0 = pmov %p6006_p4 }
  0xd5   : > { %5099 = vsyncadd (%p6009_p0), [#allocation5], 4294967280 }
  0xd6   : > { %625 = sfence }
  0xd7   : > { %s6010_s12 = sld [smem:[#allocation23_spill]]  ;;  %v5130_v2 = vmov 0   ;;  %v678_v9 = vld [vmem:[%s596_s5] sm:$0x1]  ;;  %vm752_vm0 = vcmask 261120   ;;  %v732_v13 = vlaneseq  ;;  %s838_s24 = sld [smem:[#allocation12]] }
  0xd8   : > { %788 = vmatprep.mubr.bf16.mxu0 %v5130_v2  ;;  %829 = vmatprep.mubr.bf16.mxu1 %v5130_v2  ;;  %v679_v10 = vld [vmem:[%s604_s20] sm:$0x1]  ;;  %v690_v17 = vld [vmem:[#allocation8] sm:$0xf]  ;;  %vm881_vm1 = vcmask 1040384   ;;  %vm883_vm2 = vcmask 1041408  }
  0xd9   : > { %4667 = vset.pattern.permute.xlu1 %v5130_v2  ;;  %v680_v11 = vmul.f32 %v679_v10, %v678_v9  ;;  %v5518_v14 = vshrl.u32 %v732_v13, 7  ;;  %vm885_vm3 = vcmask 1042432   ;;  %vm1270_vm4 = vcmask 31744   ;;  %s6011_s14 = sld [smem:[#allocation28_spill]]  ;;  %s6013_s19 = sld [smem:[#allocation32_spill]] }
  0xda   : > { %vm5132_vm5 = vmmov 0   ;;  %s3936_s13 = sld [smem:[#allocation12 + $0x1]]  ;;  %s6014_s0 = sld [smem:[#allocation26_spill]]  ;;  %vm2142_vm6 = vcmask 130048   ;;  %vm2852_vm7 = vcmask 523264   ;;  %vm3694_vm8 = vcmask 1043456  }
  0xdb   : > { %v681_v12 = vpack.c.bf16 %v680_v11, %v680_v11  ;;  %v734_v15 = vsub.s32 0, %v5518_v14  ;;  %v742_v16 = vsub.s32 2, %v5518_v14  ;;  %v738_v18 = vsub.s32 1, %v5518_v14  ;;  %s6015_s22 = sld [smem:[#allocation27_spill]]  ;;  %s3977_s5 = sld [smem:[#allocation12 + $0x2]] }
  0xdc   : > { %v746_v19 = vsub.s32 3, %v5518_v14  ;;  %vm3690_vm9 = vcmask 64512   ;;  %s4126_s2 = sld [smem:[#allocation12 + $0x4]]  ;;  %s3921_s18 = sshll.u32 %s5460_s15, 1  ;;  %vm3762_vm10 = vcmp.lt.s32.totalorder %v732_v13, 256 }
  0xdd   : > { %v4668_v0 = vld [vmem:[%s6010_s12 + $0x4] ss:$16 sps:$4 sm:$0xff]   ;;  %v4670_v1 = vld [vmem:[%s6010_s12 + $0xc] ss:$16 sps:$4 sm:$0xff]   ;;  %v4672_v3 = vld [vmem:[%s6010_s12] ss:$16 sps:$4 sm:$0xff]   ;;  %v735_v20 = vrot.slane %v690_v17, %v734_v15  ;;  %v743_v21 = vrot.slane %v690_v17, %v742_v16  ;;  %v739_v22 = vrot.slane %v690_v17, %v738_v18  ;;  %v839_v25 = vstv %s838_s24 }
  0xde   : > { %756 = vmatprep.subr.bf16.mxu0 %v4668_v0  ;;  %v4673_v4 = vld [vmem:[%s6010_s12 + $0x8] ss:$16 sps:$4 sm:$0xff]   ;;  %797 = vmatprep.subr.bf16.mxu1 %v4670_v1  ;;  %v4674_v5 = vld [vmem:[%s6010_s12 + $0x24] ss:$16 sps:$4 sm:$0xff]   ;;  %v4676_v6 = vld [vmem:[%s6010_s12 + $0x2c] ss:$16 sps:$4 sm:$0xff]   ;;  %v747_v23 = vrot.slane %v690_v17, %v746_v19 }
  0xdf   : > { %757 = vmatpush1.bf16.msra.mxu0 %v4672_v3  ;;  %798 = vmatpush1.bf16.msra.mxu1 %v4673_v4  ;;  %v4678_v7 = vld [vmem:[%s6010_s12 + $0x20] ss:$16 sps:$4 sm:$0xff]   ;;  %v4679_v8 = vld [vmem:[%s6010_s12 + $0x28] ss:$16 sps:$4 sm:$0xff]   ;;  %s6012_s24 = sld [smem:[#allocation31_spill]]  ;;  %s4134_s3 = sshll.u32 %s5251_s1, 5 }
  0xe0   : > { %758 = vmatprep.subr.bf16.mxu0 %v4674_v5  ;;  %799 = vmatprep.subr.bf16.mxu1 %v4676_v6  ;;  %v4680_v4 = vld [vmem:[%s5943_s4] sm:$0xff]   ;;  %v4686_v5 = vld [vmem:[%s5943_s4 + $0x30] sm:$0xff]   ;;  %s676_s9 = scalar_lea.vmem [#allocation13], %s3921_s18  ;;  %s6018_s17 = sld [smem:[#allocation35_spill]] }
  0xe1   : > { %s3780_s11 = sshll.u32 %s676_s9, 4  ;;  %p6019_p5 = scmp.ne.s32.totalorder %s5997_s23, 0  ;;  %s5897_s11 = int_to_ptr.vmem [resolvable:$true] %s3780_s11 }
  0xe2   : > { %s5036_s20 = scalar_lea.vmem %s5897_s11, 32  ;;  %s5134_s1 = smov [#allocation13]  }
  0xe3   : > { %759 = vmatpush1.bf16.msra.mxu0 %v4678_v7  ;;  %800 = vmatpush1.bf16.msra.mxu1 %v4679_v8  ;;  %p5037_p2 = scmp.ne.s32.totalorder %s5897_s11, %s5036_s20 }
  0xe5   : > { %p5038_p1 = pnand %p5037_p2, %p6019_p5 }
  0xe6   : > { %3930 = vmatmul.mubr.msk.bf16.vlgmr.msra.gmra.mrb[0].mxu0 %vm752_vm0, %v681_v12  ;;  %3931 = vmatmul.mubr.msk.bf16.vlgmr.msra.gmra.mrb[0].mxu1 %vm752_vm0, %v681_v12 }
  0xe7   : > { %4239 = vmatprep.mubr.bf16.mxu0 %v4680_v4  ;;  %4251 = vmatprep.mubr.bf16.mxu1 %v4686_v5  ;;  %p5039_p3 = pneg %p5038_p1 }
 0x1b9   : > { %v790_v24 = vpop.f32.mrb[0].mxu0  ;;  %v831_v26 = vpop.f32.mrb[0].mxu1 }
 0x1ba   : > { %v791_v27 = vadd.f32 %v790_v24, %v735_v20  ;;  %v832_v28 = vadd.f32 %v831_v26, %v743_v21  ;;  %v792_v29 = vpop.f32.mrb[1].mxu0  ;;  %v833_v30 = vpop.f32.mrb[1].mxu1 }
 0x1bb   : > { %v793_v31 = vadd.f32 %v792_v29, %v739_v22  ;;  %v834_v32 = vadd.f32 %v833_v30, %v747_v23  ;;  %v794_v33 = vpop.f32.mrb[2].mxu0  ;;  %v835_v34 = vpop.f32.mrb[2].mxu1 }
 0x1bc   : > { %v840_v35 = vmul.f32 %v839_v25, %v791_v27  ;;  %v842_v36 = vmul.f32 %v839_v25, %v832_v28  ;;  %v795_v37 = vpop.f32.mrb[3].mxu0  ;;  %v836_v38 = vpop.f32.mrb[3].mxu1  ;;  %v4687_v33 = vld [vmem:[%s5943_s4 + $0x38] sm:$0xff]   ;;  %v4682_v34 = vld [vmem:[%s5943_s4 + $0x10] sm:$0xff]  }
 0x1bd   : > { %v841_v39 = vmul.f32 %v839_v25, %v793_v31  ;;  %v843_v40 = vmul.f32 %v839_v25, %v834_v32  ;;  %v4689_v37 = vld [vmem:[%s5943_s4 + $0x48] sm:$0xff]   ;;  %v4684_v38 = vld [vmem:[%s5943_s4 + $0x20] sm:$0xff]  }
 0x1be   : > { %v3932_v41 = vmul.f32 -1.442695, %v840_v35  ;;  %v3934_v42 = vmul.f32 -1.442695, %v842_v36  ;;  %v4688_v35 = vld [vmem:[%s5943_s4 + $0x40] sm:$0xff]   ;;  %v4683_v36 = vld [vmem:[%s5943_s4 + $0x18] sm:$0xff]  }
 0x1bf   : > { %v3933_v43 = vmul.f32 -1.442695, %v841_v39  ;;  %v3935_v44 = vmul.f32 -1.442695, %v843_v40  ;;  %v4690_v39 = vld [vmem:[%s5943_s4 + $0x50] sm:$0xff]   ;;  %v4685_v40 = vld [vmem:[%s5943_s4 + $0x28] sm:$0xff]  }
 0x1c0   : > { %4829 = vpow2.f32 %v3932_v41  ;;  %v4691_v41 = vld [vmem:[%s5943_s4 + $0x58] sm:$0xff]  }
 0x1c1   : > { %4831 = vpow2.f32 %v3934_v42  ;;  %v4692_v42 = vld [vmem:[%s5943_s4 + $0x60] sm:$0xff]  }
 0x1c2   : > { %4833 = vpow2.f32 %v3933_v43  ;;  %v4693_v43 = vld [vmem:[%s5943_s4 + $0x68] sm:$0xff]  }
 0x1c3   : > { %4835 = vpow2.f32 %v3935_v44  ;;  %v4694_v44 = vld [vmem:[%s5943_s4 + $0x70] sm:$0xff]  }
 0x1ca   : > { %v4830_v45 = vpop.eup %4829 }
 0x1cb   : > { %v4832_v46 = vpop.eup %4831  ;;  %v856_v47 = vadd.f32 1.0, %v4830_v45  ;;  %v4695_v45 = vld [vmem:[%s5943_s4 + $0x78] sm:$0xff]  }
 0x1cc   : > { %v4834_v48 = vpop.eup %4833  ;;  %v858_v49 = vadd.f32 1.0, %v4832_v46  ;;  %v4696_v46 = vld [vmem:[%s5943_s4 + $0x80] sm:$0xff]  }
 0x1cd   : > { %v4836_v50 = vpop.eup %4835  ;;  %4837 = vrcp.f32 %v856_v47  ;;  %v857_v51 = vadd.f32 1.0, %v4834_v48  ;;  %v4697_v47 = vld [vmem:[%s5943_s4 + $0x88] sm:$0xff]  }
 0x1ce   : > { %4839 = vrcp.f32 %v858_v49  ;;  %v859_v52 = vadd.f32 1.0, %v4836_v50  ;;  %v1269_v48 = vld [vmem:[#allocation9 + $0x2] sm:$0x3]  ;;  %v1267_v50 = vld [vmem:[#allocation9] sm:$0x3] }
 0x1cf   : > { %4841 = vrcp.f32 %v857_v51  ;;  %v1278_v49 = vsel %vm883_vm2, %v1269_v48, 0  ;;  %v1836_v51 = vld [vmem:[%s5945_s6 + $0x8] sm:$0xff] }
 0x1d0   : > { %4843 = vrcp.f32 %v859_v52  ;;  %1846 = vperm.xlu1 %4667, %v1836_v51   ;;  %v1863_v52 = vld [vmem:[%s5946_s7] sm:$0xff] }
 0x1d4   : > { %1869 = vperm.xlu1 %4667, %v1863_v52  }
 0x1d7   : > { %v4838_v53 = vpop.eup %4837 }
 0x1d8   : > { %v4840_v54 = vpop.eup %4839  ;;  %v868_v60 = vmul.f32 %v4838_v53, %v791_v27  ;;  %v1835_v53 = vld [vmem:[%s5945_s6] sm:$0xff] }
 0x1d9   : > { %v4842_v55 = vpop.eup %4841  ;;  %v870_v56 = vmul.f32 %v4840_v54, %v832_v28  ;;  %v1864_v54 = vld [vmem:[%s5946_s7 + $0x8] sm:$0xff] }
 0x1da   : > { %v4844_v57 = vpop.eup %4843  ;;  %v869_v58 = vmul.f32 %v4842_v55, %v793_v31  ;;  %1874 = vperm.xlu1 %4667, %v1864_v54   ;;  %v1837_v55 = vld [vmem:[%s5945_s6 + $0x10] sm:$0xff] }
 0x1db   : > { %v871_v59 = vmul.f32 %v4844_v57, %v834_v32  ;;  %v876_v62 = vrot.slane %v870_v56, 6  ;;  %v4681_v32 = vld [vmem:[%s5943_s4 + $0x8] sm:$0xff]   ;;  %v1838_v56 = vld [vmem:[%s5945_s6 + $0x18] sm:$0xff] }
 0x1dc   : > { %v873_v61 = vrot.slane %v869_v58, 7 }
 0x1dd   : > { %v879_v63 = vrot.slane %v871_v59, 5 }
 0x1de   : > { %v882_v0 = vsel %vm881_vm1, %v868_v60, %v873_v61  ;;  %1851 = vperm.xlu1 %4667, %v1837_v55   ;;  %v1865_v61 = vld [vmem:[%s5946_s7 + $0x10] sm:$0xff] }
 0x1df   : > { %v884_v1 = vsel %vm883_vm2, %v882_v0, %v876_v62 }
 0x1e0   : > { %v886_v3 = vsel %vm885_vm3, %v884_v1, %v879_v63 }
 0x1e1   : > { %887 = vxpose.xlu0.b32.start.end [1/1] (short) %v886_v3, 128 }
 0x1e2   : > { %1856 = vperm.xlu1 %4667, %v1838_v56  }
 0x1e6   : > { %1879 = vperm.xlu1 %4667, %v1865_v61  }
 0x20a   : > { %4666 = vset.pattern.permute.xlu0 %v5130_v2 }
 0x246   : > { %1841 = vperm.xlu0 %4666, %v1835_v53  }
 0x261   : > { %v903_v6 = vpop.trf.xlu0 }
 0x265   : > { %v904_v7 = vpop.trf.xlu0 }
 0x266   : > { %v956_v8 = vpack.c.bf16 %v904_v7, %v903_v6  ;;  %v1866_v7 = vld [vmem:[%s5946_s7 + $0x18] sm:$0xff] }
 0x267   : > { %1884 = vperm.xlu1 %4667, %v1866_v7  }
 0x268   : > { %4223 = vmatprep.subr.bf16.mxu0 %v956_v8  ;;  %4445 = vmatprep.subr.bf16.mxu1 %v956_v8 }
 0x269   : > { %4224 = vmatpush3.bf16.msra.mxu0 %v956_v8  ;;  %4453 = vmatpush3.bf16.msra.mxu1 %v956_v8  ;;  %v905_v9 = vpop.trf.xlu0 }
 0x26d   : > { %v906_v10 = vpop.trf.xlu0 }
 0x26e   : > { %v957_v11 = vpack.c.bf16 %v906_v10, %v905_v9 }
 0x270   : > { %4225 = vmatprep.subr.bf16.mxu0 %v957_v11  ;;  %4446 = vmatprep.subr.bf16.mxu1 %v957_v11 }
 0x271   : > { %4226 = vmatpush3.bf16.msra.mxu0 %v957_v11  ;;  %4454 = vmatpush3.bf16.msra.mxu1 %v957_v11  ;;  %v907_v12 = vpop.trf.xlu0 }
 0x275   : > { %v908_v15 = vpop.trf.xlu0 }
 0x276   : > { %v958_v16 = vpack.c.bf16 %v908_v15, %v907_v12  ;;  %v2622_v12 = vld [vmem:[%s5949_s10] sm:$0xff] }
 0x277   : > { %2626 = vperm.xlu1 %4667, %v2622_v12  }
 0x278   : > { %4227 = vmatprep.subr.bf16.mxu0 %v958_v16  ;;  %4447 = vmatprep.subr.bf16.mxu1 %v958_v16 }
 0x279   : > { %4228 = vmatpush3.bf16.msra.mxu0 %v958_v16  ;;  %4455 = vmatpush3.bf16.msra.mxu1 %v958_v16  ;;  %v909_v17 = vpop.trf.xlu0 }
 0x27d   : > { %v910_v18 = vpop.trf.xlu0 }
 0x27e   : > { %v959_v19 = vpack.c.bf16 %v910_v18, %v909_v17 }
 0x280   : > { %4229 = vmatprep.subr.bf16.mxu0 %v959_v19  ;;  %4448 = vmatprep.subr.bf16.mxu1 %v959_v19 }
 0x281   : > { %4230 = vmatpush3.bf16.msra.mxu0 %v959_v19  ;;  %4456 = vmatpush3.bf16.msra.mxu1 %v959_v19  ;;  %v911_v20 = vpop.trf.xlu0 }
 0x285   : > { %v912_v21 = vpop.trf.xlu0 }
 0x286   : > { %v960_v22 = vpack.c.bf16 %v912_v21, %v911_v20 }
 0x288   : > { %4231 = vmatprep.subr.bf16.mxu0 %v960_v22  ;;  %4449 = vmatprep.subr.bf16.mxu1 %v960_v22 }
 0x289   : > { %4232 = vmatpush3.bf16.msra.mxu0 %v960_v22  ;;  %4457 = vmatpush3.bf16.msra.mxu1 %v960_v22  ;;  %v913_v23 = vpop.trf.xlu0 }
 0x28d   : > { %v914_v24 = vpop.trf.xlu0 }
 0x28e   : > { %v961_v25 = vpack.c.bf16 %v914_v24, %v913_v23  ;;  %v1336_v23 = vsel %vm883_vm2, %v1267_v50, 0  ;;  %v1388_v24 = vld [vmem:[#allocation9 + $0x4] sm:$0x3] }
 0x290   : > { %4233 = vmatprep.subr.bf16.mxu0 %v961_v25  ;;  %4450 = vmatprep.subr.bf16.mxu1 %v961_v25 }
 0x291   : > { %4234 = vmatpush3.bf16.msra.mxu0 %v961_v25  ;;  %4458 = vmatpush3.bf16.msra.mxu1 %v961_v25  ;;  %v915_v26 = vpop.trf.xlu0  ;;  %v2623_v25 = vld [vmem:[%s5949_s10 + $0x8] sm:$0xff] }
 0x292   : > { %2631 = vperm.xlu1 %4667, %v2623_v25  }
 0x295   : > { %v916_v27 = vpop.trf.xlu0 }
 0x296   : > { %v962_v28 = vpack.c.bf16 %v916_v27, %v915_v26 }
 0x298   : > { %4235 = vmatprep.subr.bf16.mxu0 %v962_v28  ;;  %4451 = vmatprep.subr.bf16.mxu1 %v962_v28 }
 0x299   : > { %4236 = vmatpush3.bf16.msra.mxu0 %v962_v28  ;;  %4459 = vmatpush3.bf16.msra.mxu1 %v962_v28  ;;  %v917_v29 = vpop.trf.xlu0 }
 0x29d   : > { %v918_v30 = vpop.trf.xlu0 }
 0x29e   : > { %v963_v31 = vpack.c.bf16 %v918_v30, %v917_v29 }
 0x2a0   : > { %4237 = vmatprep.subr.bf16.mxu0 %v963_v31  ;;  %4452 = vmatprep.subr.bf16.mxu1 %v963_v31 }
 0x2a1   : > { %4238 = vmatpush3.bf16.msra.mxu0 %v963_v31  ;;  %4460 = vmatpush3.bf16.msra.mxu1 %v963_v31 }
 0x2a2   : > { %4557 = vmatprep.subr.msk.bf16.mxu1 %vm883_vm2, %v1269_v48 }
 0x2a4   : > { %4240 = vmatmul.mubr.bf16.vlgmr.msra.gmra.mrb[4].mxu0 %v4681_v32  ;;  %4252 = vmatmul.mubr.bf16.vlgmr.msra.gmra.mrb[4].mxu1 %v4687_v33  ;;  %v2636_v32 = vld [vmem:[%s6011_s14] sm:$0xff] }
 0x2a5   : > { %4243 = vmatprep.mubr.bf16.mxu0 %v4682_v34  ;;  %4255 = vmatprep.mubr.bf16.mxu1 %v4688_v35 }
 0x2a6   : > { %4276 = vmatpush3.bf16.msra.mxu1 %v1278_v49  ;;  %2640 = vperm.xlu1 %4667, %v2636_v32   ;;  %v3660_v49 = vld [vmem:[%s6013_s19] sm:$0xff]  ;;  %s6017_s19 = sld [smem:[#allocation33_spill]] }
 0x2a7   : > { %4558 = vmatprep.subr.msk.bf16.mxu1 %vm883_vm2, %v1267_v50 }
 0x2ac   : > { %4244 = vmatmul.mubr.bf16.gmra.mrb[8].mxu0 %v4683_v36  ;;  %4256 = vmatmul.mubr.bf16.gmra.mrb[8].mxu1 %v4689_v37 }
 0x2ad   : > { %4247 = vmatprep.mubr.bf16.mxu0 %v4684_v38  ;;  %4259 = vmatprep.mubr.bf16.mxu1 %v4690_v39  ;;  %v2637_v39 = vld [vmem:[%s6011_s14 + $0x8] sm:$0xff] }
 0x2ae   : > { %2645 = vperm.xlu1 %4667, %v2637_v39  }
 0x2b4   : > { %4248 = vmatmul.mubr.bf16.gmra.mrb[12].mxu0 %v4685_v40  ;;  %4260 = vmatmul.mubr.bf16.gmra.mrb[12].mxu1 %v4691_v41  ;;  %v1396_v41 = vsel %vm883_vm2, %v1388_v24, 0 }
 0x2b5   : > { %4263 = vmatprep.mubr.bf16.mxu1 %v4692_v42 }
 0x2bc   : > { %4264 = vmatmul.mubr.bf16.gmra.mrb[16].mxu1 %v4693_v43  ;;  %v1452_v43 = vld [vmem:[#allocation9 + $0x6] sm:$0x3] }
 0x2bd   : > { %4267 = vmatprep.mubr.bf16.mxu1 %v4694_v44  ;;  %v1460_v56 = vsel %vm883_vm2, %v1452_v43, 0 }
 0x2c4   : > { %4268 = vmatmul.mubr.bf16.gmra.mrb[20].mxu1 %v4695_v45  ;;  %v3652_v45 = vld [vmem:[%s6012_s24] sm:$0xff]  ;;  %s4032_s24 = sld [smem:[#allocation12 + $0x3]] }
 0x2c5   : > { %4271 = vmatprep.mubr.bf16.mxu1 %v4696_v46  ;;  %3655 = vperm.xlu1 %4667, %v3652_v45  }
 0x2c9   : > { %3663 = vperm.xlu1 %4667, %v3660_v49  }
 0x2cc   : > { %4272 = vmatmul.mubr.bf16.gmra.mrb[24].mxu1 %v4697_v47 }
 0x377   : > { %v5601_v57 = vpop.f32.mrb[4].mxu0  ;;  %v5603_v58 = vpop.f32.mrb[4].mxu1 }
 0x378   : > { %v1106_v59 = vpop.f32.mrb[5].mxu0  ;;  %v5605_v60 = vpop.f32.mrb[5].mxu1 }
 0x379   : > { %v4242_v62 = vpop.f32.mrb[6].mxu0  ;;  %v5610_v63 = vpop.f32.mrb[6].mxu1 }
 0x37a   : > { %v1250_v0 = vpack.c.bf16 %v4242_v62, %v5601_v57  ;;  %v1109_v1 = vpop.f32.mrb[7].mxu0  ;;  %v1256_v3 = vpack.c.bf16 %v5610_v63, %v5603_v58  ;;  %v5615_v4 = vpop.f32.mrb[7].mxu1  ;;  %v1516_v57 = vld [vmem:[#allocation9 + $0x8] sm:$0x3]  ;;  %v1708_v63 = vld [vmem:[#allocation9 + $0xe] sm:$0x3] }
 0x37b   : > { %v1249_v5 = vpack.c.bf16 %v1109_v1, %v1106_v59  ;;  %v1255_v6 = vpack.c.bf16 %v5615_v4, %v5605_v60  ;;  %v1524_v7 = vsel %vm883_vm2, %v1516_v57, 0  ;;  %v1644_v4 = vld [vmem:[#allocation9 + $0xc] sm:$0x3] }
 0x37c   : > { %v1652_v58 = vsel %vm883_vm2, %v1644_v4, 0 }
 0x37f   : > { %v4245_v8 = vpop.f32.mrb[8].mxu0  ;;  %v5622_v9 = vpop.f32.mrb[8].mxu1 }
 0x380   : > { %v1122_v10 = vpop.f32.mrb[9].mxu0  ;;  %v5624_v11 = vpop.f32.mrb[9].mxu1 }
 0x381   : > { %v4246_v15 = vpop.f32.mrb[10].mxu0  ;;  %v5629_v16 = vpop.f32.mrb[10].mxu1 }
 0x382   : > { %v1252_v17 = vpack.c.bf16 %v4246_v15, %v4245_v8  ;;  %v1125_v18 = vpop.f32.mrb[11].mxu0  ;;  %v1258_v19 = vpack.c.bf16 %v5629_v16, %v5622_v9  ;;  %v5633_v20 = vpop.f32.mrb[11].mxu1  ;;  %v1580_v8 = vld [vmem:[#allocation9 + $0xa] sm:$0x3] }
 0x383   : > { %v1251_v21 = vpack.c.bf16 %v1125_v18, %v1122_v10  ;;  %v1257_v22 = vpack.c.bf16 %v5633_v20, %v5624_v11  ;;  %v1588_v60 = vsel %vm883_vm2, %v1580_v8, 0  ;;  %v5131_v10 = vmov 0.0   ;;  %v1847_v11 = vpop.permute.xlu1 %1846 }
 0x384   : > { %4369 = vmatprep.subr.bf16.mxu0 %v5131_v10  ;;  %4371 = vmatprep.mubr.msk.bf16.mxu0 %vm5132_vm5, %v5131_v10 }
 0x385   : > { %4277 = vmatprep.mubr.msk.bf16.mxu1 %vm1270_vm4, %v1251_v21 }
 0x386   : > { %4278 = vmatmul.mubr.msk.bf16.vlgmr.msra.gmra.mrb[28].mxu1 %vm1270_vm4, %v1252_v17 }
 0x387   : > { %4283 = vmatprep.mubr.msk.bf16.mxu1 %vm1270_vm4, %v1249_v5  ;;  %4282 = vmatpush3.bf16.msra.mxu1 %v1336_v23  ;;  %v4249_v26 = vpop.f32.mrb[12].mxu0  ;;  %v5644_v27 = vpop.f32.mrb[12].mxu1  ;;  %v1891_v23 = vstv %s3936_s13  ;;  %s6016_s13 = sld [smem:[#allocation29_spill]] }
 0x388   : > { %v1138_v28 = vpop.f32.mrb[13].mxu0  ;;  %4559 = vmatprep.subr.msk.bf16.mxu1 %vm883_vm2, %v1388_v24  ;;  %v1186_v29 = vpop.f32.mrb[13].mxu1 }
 0x389   : > { %v4250_v30 = vpop.f32.mrb[14].mxu0  ;;  %v4262_v31 = vpop.f32.mrb[14].mxu1 }
 0x38a   : > { %v1254_v33 = vpack.c.bf16 %v4250_v30, %v4249_v26  ;;  %v1141_v34 = vpop.f32.mrb[15].mxu0  ;;  %v1260_v35 = vpack.c.bf16 %v4262_v31, %v5644_v27  ;;  %v1189_v36 = vpop.f32.mrb[15].mxu1 }
 0x38b   : > { %v1253_v37 = vpack.c.bf16 %v1141_v34, %v1138_v28  ;;  %v1259_v38 = vpack.c.bf16 %v1189_v36, %v1186_v29  ;;  %v1870_v12 = vpop.permute.xlu1 %1869 }
 0x38f   : > { %v4265_v40 = vpop.f32.mrb[16].mxu1  ;;  %v1875_v15 = vpop.permute.xlu1 %1874 }
 0x390   : > { %v1202_v42 = vpop.f32.mrb[17].mxu1 }
 0x391   : > { %v4266_v44 = vpop.f32.mrb[18].mxu1 }
 0x392   : > { %4284 = vmatmul.mubr.msk.bf16.vlgmr.msra.gmra.mrb[28].mxu1 %vm1270_vm4, %v1250_v0  ;;  %v1262_v46 = vpack.c.bf16 %v4266_v44, %v4265_v40  ;;  %v1205_v47 = vpop.f32.mrb[19].mxu1 }
 0x393   : > { %4289 = vmatprep.mubr.msk.bf16.mxu1 %vm1270_vm4, %v1253_v37  ;;  %4288 = vmatpush3.bf16.msra.mxu1 %v1396_v41  ;;  %v1261_v48 = vpack.c.bf16 %v1205_v47, %v1202_v42  ;;  %v1852_v16 = vpop.permute.xlu1 %1851 }
 0x394   : > { %4560 = vmatprep.subr.msk.bf16.mxu1 %vm883_vm2, %v1452_v43 }
 0x397   : > { %v4269_v50 = vpop.f32.mrb[20].mxu1  ;;  %v1857_v17 = vpop.permute.xlu1 %1856 }
 0x398   : > { %v1218_v51 = vpop.f32.mrb[21].mxu1 }
 0x399   : > { %v4270_v52 = vpop.f32.mrb[22].mxu1 }
 0x39a   : > { %v1264_v53 = vpack.c.bf16 %v4270_v52, %v4269_v50  ;;  %v1221_v54 = vpop.f32.mrb[23].mxu1 }
 0x39b   : > { %v1263_v55 = vpack.c.bf16 %v1221_v54, %v1218_v51  ;;  %v1880_v18 = vpop.permute.xlu1 %1879 }
 0x39e   : > { %4290 = vmatmul.mubr.msk.bf16.vlgmr.msra.gmra.mrb[28].mxu1 %vm1270_vm4, %v1254_v33 }
 0x39f   : > { %4295 = vmatprep.mubr.msk.bf16.mxu1 %vm1270_vm4, %v1255_v6  ;;  %4294 = vmatpush3.bf16.msra.mxu1 %v1460_v56  ;;  %v4273_v59 = vpop.f32.mrb[24].mxu1  ;;  %v1772_v6 = vld [vmem:[#allocation9 + $0x10] sm:$0x3]  ;;  %v1885_v29 = vpop.permute.xlu1 %1884 }
 0x3a0   : > { %4561 = vmatprep.subr.msk.bf16.mxu1 %vm883_vm2, %v1516_v57  ;;  %v1234_v61 = vpop.f32.mrb[25].mxu1  ;;  %v1780_v9 = vsel %vm883_vm2, %v1772_v6, 0 }
 0x3a1   : > { %v4274_v62 = vpop.f32.mrb[26].mxu1 }
 0x3a2   : > { %v1266_v0 = vpack.c.bf16 %v4274_v62, %v4273_v59  ;;  %v1237_v1 = vpop.f32.mrb[27].mxu1  ;;  %v4698_v62 = vld [vmem:[%s6014_s0] sm:$0xff]  }
 0x3a3   : > { %v1265_v5 = vpack.c.bf16 %v1237_v1, %v1234_v61  ;;  %v4700_v1 = vld [vmem:[%s6014_s0 + $0x10] sm:$0xff]  }
 0x3aa   : > { %4296 = vmatmul.mubr.msk.bf16.vlgmr.msra.gmra.mrb[28].mxu1 %vm1270_vm4, %v1256_v3  ;;  %v1716_v3 = vsel %vm883_vm2, %v1708_v63, 0 }
 0x3ab   : > { %4301 = vmatprep.mubr.msk.bf16.mxu1 %vm1270_vm4, %v1257_v22  ;;  %4300 = vmatpush3.bf16.msra.mxu1 %v1524_v7  ;;  %v4702_v7 = vld [vmem:[%s6014_s0 + $0x20] sm:$0xff]  }
 0x3ac   : > { %4562 = vmatprep.subr.msk.bf16.mxu1 %vm883_vm2, %v1580_v8  ;;  %v4703_v8 = vld [vmem:[%s6014_s0 + $0x28] sm:$0xff]  }
 0x3b6   : > { %4302 = vmatmul.mubr.msk.bf16.vlgmr.msra.gmra.mrb[28].mxu1 %vm1270_vm4, %v1258_v19  ;;  %v1842_v19 = vpop.permute.xlu0 %1841 }
 0x3b7   : > { %4307 = vmatprep.mubr.msk.bf16.mxu1 %vm1270_vm4, %v1259_v38  ;;  %4306 = vmatpush3.bf16.msra.mxu1 %v1588_v60  ;;  %v4704_v60 = vld [vmem:[%s6014_s0 + $0x30] sm:$0xff]  }
 0x3b8   : > { %4563 = vmatprep.subr.msk.bf16.mxu1 %vm883_vm2, %v1644_v4  ;;  %v4705_v4 = vld [vmem:[%s6014_s0 + $0x38] sm:$0xff]  }
 0x3c2   : > { %4308 = vmatmul.mubr.msk.bf16.vlgmr.msra.gmra.mrb[28].mxu1 %vm1270_vm4, %v1260_v35 }
 0x3c3   : > { %4313 = vmatprep.mubr.msk.bf16.mxu1 %vm1270_vm4, %v1261_v48  ;;  %4312 = vmatpush3.bf16.msra.mxu1 %v1652_v58  ;;  %v4706_v58 = vld [vmem:[%s6014_s0 + $0x40] sm:$0xff]  }
 0x3c4   : > { %4564 = vmatprep.subr.msk.bf16.mxu1 %vm883_vm2, %v1708_v63  ;;  %v4707_v63 = vld [vmem:[%s6015_s22 + $0x8] sm:$0xff]  }
 0x3c5   : > { %4370 = vmatpush3.bf16.msra.mxu0 %v4707_v63  ;;  %v2627_v63 = vpop.permute.xlu1 %2626 }
 0x3c6   : > { %4375 = vmatprep.subr.bf16.mxu0 %v5131_v10 }
 0x3ce   : > { %4314 = vmatmul.mubr.msk.bf16.vlgmr.msra.gmra.mrb[28].mxu1 %vm1270_vm4, %v1262_v46 }
 0x3cf   : > { %4319 = vmatprep.mubr.msk.bf16.mxu1 %vm1270_vm4, %v1263_v55  ;;  %4318 = vmatpush3.bf16.msra.mxu1 %v1716_v3 }
 0x3d0   : > { %4565 = vmatprep.subr.msk.bf16.mxu1 %vm883_vm2, %v1772_v6 }
 0x3da   : > { %4320 = vmatmul.mubr.msk.bf16.vlgmr.msra.gmra.mrb[28].mxu1 %vm1270_vm4, %v1264_v53 }
 0x3db   : > { %4325 = vmatprep.mubr.msk.bf16.mxu1 %vm1270_vm4, %v1265_v5  ;;  %4324 = vmatpush3.bf16.msra.mxu1 %v1780_v9  ;;  %v4701_v5 = vld [vmem:[%s6014_s0 + $0x18] sm:$0xff]  }
 0x3dc   : > { %4329 = vmatprep.subr.bf16.mxu1 %v5131_v10 }
 0x3e6   : > { %4326 = vmatmul.mubr.msk.bf16.vlgmr.msra.gmra.mrb[28].mxu1 %vm1270_vm4, %v1266_v0  ;;  %v4699_v0 = vld [vmem:[%s6014_s0 + $0x8] sm:$0xff]  }
 0x3e7   : > { %4333 = vmatprep.mubr.msk.bf16.mxu1 %vm5132_vm5, %v5131_v10 }
 0x4b9   : > { %v4327_v20 = vpop.f32.mrb[28].mxu1 }
 0x4ba   : > { %v1861_v21 = vmul.f32 %v4327_v20, %v1852_v16  ;;  %v1816_v22 = vpop.f32.mrb[29].mxu1 }
 0x4bb   : > { %v1859_v24 = vmul.f32 %v1842_v19, %v1816_v22  ;;  %v4328_v25 = vpop.f32.mrb[30].mxu1 }
 0x4bc   : > { %v1889_v26 = vadd.f32 %v1880_v18, %v1861_v21  ;;  %v1862_v27 = vmul.f32 %v4328_v25, %v1857_v17  ;;  %v1819_v28 = vpop.f32.mrb[31].mxu1  ;;  %v4708_v18 = vld [vmem:[%s6015_s22] sm:$0xff]  }
 0x4bd   : > { %v1887_v30 = vadd.f32 %v1870_v12, %v1859_v24  ;;  %v1860_v31 = vmul.f32 %v1847_v11, %v1819_v28 }
 0x4be   : > { %v1894_v32 = vmul.f32 %v1891_v23, %v1889_v26  ;;  %v1890_v33 = vadd.f32 %v1885_v29, %v1862_v27 }
 0x4bf   : > { %v1892_v34 = vmul.f32 %v1891_v23, %v1887_v30  ;;  %v1888_v35 = vadd.f32 %v1875_v15, %v1860_v31 }
 0x4c0   : > { %v3975_v36 = vmul.f32 -1.442695, %v1894_v32  ;;  %v1895_v37 = vmul.f32 %v1891_v23, %v1890_v33 }
 0x4c1   : > { %v3973_v38 = vmul.f32 -1.442695, %v1892_v34  ;;  %v1893_v39 = vmul.f32 %v1891_v23, %v1888_v35  ;;  %v4710_v34 = vld [vmem:[%s6015_s22 + $0x18] sm:$0xff]  }
 0x4c2   : > { %4845 = vpow2.f32 %v3975_v36  ;;  %v3976_v40 = vmul.f32 -1.442695, %v1895_v37 }
 0x4c3   : > { %4847 = vpow2.f32 %v3973_v38  ;;  %v3974_v41 = vmul.f32 -1.442695, %v1893_v39 }
 0x4c4   : > { %4849 = vpow2.f32 %v3976_v40 }
 0x4c5   : > { %4851 = vpow2.f32 %v3974_v41 }
 0x4cc   : > { %v4846_v42 = vpop.eup %4845 }
 0x4cd   : > { %v4848_v43 = vpop.eup %4847  ;;  %v1910_v44 = vadd.f32 1.0, %v4846_v42 }
 0x4ce   : > { %v4850_v45 = vpop.eup %4849  ;;  %v1908_v46 = vadd.f32 1.0, %v4848_v43  ;;  %v4711_v43 = vld [vmem:[%s6015_s22 + $0x20] sm:$0xff]  }
 0x4cf   : > { %v4852_v47 = vpop.eup %4851  ;;  %4853 = vrcp.f32 %v1910_v44  ;;  %v1911_v48 = vadd.f32 1.0, %v4850_v45 }
 0x4d0   : > { %4855 = vrcp.f32 %v1908_v46  ;;  %v1909_v49 = vadd.f32 1.0, %v4852_v47 }
 0x4d1   : > { %4857 = vrcp.f32 %v1911_v48 }
 0x4d2   : > { %4859 = vrcp.f32 %v1909_v49 }
 0x4d9   : > { %v4854_v50 = vpop.eup %4853 }
 0x4da   : > { %v4856_v51 = vpop.eup %4855  ;;  %v1922_v54 = vmul.f32 %v4854_v50, %v1889_v26  ;;  %v4709_v26 = vld [vmem:[%s6015_s22 + $0x10] sm:$0xff]  }
 0x4db   : > { %v4858_v52 = vpop.eup %4857  ;;  %v1920_v56 = vmul.f32 %v4856_v51, %v1887_v30  ;;  %v4712_v51 = vld [vmem:[%s6015_s22 + $0x28] sm:$0xff]  }
 0x4dc   : > { %v4860_v53 = vpop.eup %4859  ;;  %v1923_v55 = vmul.f32 %v4858_v52, %v1890_v33 }
 0x4dd   : > { %v1921_v57 = vmul.f32 %v4860_v53, %v1888_v35 }
 0x4de   : > { %v1944_v59 = vpack.c.bf16 %v1923_v55, %v1922_v54 }
 0x4df   : > { %v1943_v61 = vpack.c.bf16 %v1921_v57, %v1920_v56 }
 0x4e1   : > { %4330 = vmatpush3.bf16.msra.mxu1 %v1943_v61 }
 0x4e2   : > { %4331 = vmatprep.subr.bf16.mxu1 %v5131_v10 }
 0x4e5   : > { %4332 = vmatpush3.bf16.msra.mxu1 %v1944_v59 }
 0x4e6   : > { %4423 = vmatprep.subr.bf16.mxu1 %v5131_v10 }
 0x4e8   : > { %4334 = vmatmul.mubr.msk.bf16.vlgmr.msra.gmra.mrb[32].mxu1 %vm752_vm0, %v4698_v62  ;;  %v4713_v62 = vld [vmem:[%s6015_s22 + $0x30] sm:$0xff]  }
 0x4e9   : > { %4337 = vmatprep.mubr.msk.bf16.mxu1 %vm5132_vm5, %v5131_v10 }
 0x4f0   : > { %4338 = vmatmul.mubr.msk.bf16.gmra.mrb[36].mxu1 %vm752_vm0, %v4699_v0  ;;  %v4714_v0 = vld [vmem:[%s6015_s22 + $0x38] sm:$0xff]  }
 0x4f1   : > { %4341 = vmatprep.mubr.msk.bf16.mxu1 %vm5132_vm5, %v5131_v10 }
 0x4f8   : > { %4342 = vmatmul.mubr.msk.bf16.gmra.mrb[40].mxu1 %vm752_vm0, %v4700_v1  ;;  %v4715_v1 = vld [vmem:[%s6015_s22 + $0x40] sm:$0xff]  }
 0x4f9   : > { %4345 = vmatprep.mubr.msk.bf16.mxu1 %vm5132_vm5, %v5131_v10 }
 0x500   : > { %4346 = vmatmul.mubr.msk.bf16.gmra.mrb[44].mxu1 %vm752_vm0, %v4701_v5  ;;  %v4721_v5 = vld [vmem:[#allocation11 + $0x40] ss:$8 sps:$4 sm:$0xff]  }
 0x501   : > { %4349 = vmatprep.mubr.msk.bf16.mxu1 %vm5132_vm5, %v5131_v10 }
 0x508   : > { %4350 = vmatmul.mubr.msk.bf16.gmra.mrb[48].mxu1 %vm752_vm0, %v4702_v7  ;;  %v4723_v7 = vld [vmem:[#allocation11 + $0x44] ss:$8 sps:$4 sm:$0xff]  }
 0x509   : > { %4353 = vmatprep.mubr.msk.bf16.mxu1 %vm5132_vm5, %v5131_v10 }
 0x510   : > { %4354 = vmatmul.mubr.msk.bf16.gmra.mrb[52].mxu1 %vm752_vm0, %v4703_v8  ;;  %v4726_v8 = vld [vmem:[#allocation11 + $0x54] ss:$8 sps:$4 sm:$0xff]  }
 0x511   : > { %4357 = vmatprep.mubr.msk.bf16.mxu1 %vm5132_vm5, %v5131_v10 }
 0x518   : > { %4358 = vmatmul.mubr.msk.bf16.gmra.mrb[56].mxu1 %vm752_vm0, %v4704_v60  ;;  %v4724_v60 = vld [vmem:[#allocation11 + $0x50] ss:$8 sps:$4 sm:$0xff]  }
 0x519   : > { %4361 = vmatprep.mubr.msk.bf16.mxu1 %vm5132_vm5, %v5131_v10 }
 0x520   : > { %4362 = vmatmul.mubr.msk.bf16.gmra.mrb[60].mxu1 %vm752_vm0, %v4705_v4  ;;  %v4729_v4 = vld [vmem:[#allocation11 + $0x64] ss:$8 sps:$4 sm:$0xff]  }
 0x521   : > { %4365 = vmatprep.mubr.msk.bf16.mxu1 %vm5132_vm5, %v5131_v10 }
 0x528   : > { %4366 = vmatmul.mubr.msk.bf16.gmra.mrb[64].mxu1 %vm752_vm0, %v4706_v58  ;;  %v4727_v58 = vld [vmem:[#allocation11 + $0x60] ss:$8 sps:$4 sm:$0xff]  }
 0x529   : > { %4425 = vmatprep.mubr.msk.bf16.mxu1 %vm5132_vm5, %v5131_v10 }
 0x5bb   : > { %v2051_v3 = vpop.f32.mrb[32].mxu1 }
 0x5bc   : > { %v4335_v6 = vpop.f32.mrb[33].mxu1 }
 0x5bd   : > { %v2054_v9 = vpop.f32.mrb[34].mxu1 }
 0x5be   : > { %v2122_v11 = vpack.c.bf16 %v2054_v9, %v2051_v3  ;;  %v4336_v12 = vpop.f32.mrb[35].mxu1  ;;  %v2632_v3 = vpop.permute.xlu1 %2631 }
 0x5c2   : > { %v2641_v6 = vpop.permute.xlu1 %2640 }
 0x5c3   : > { %v2059_v15 = vpop.f32.mrb[36].mxu1 }
 0x5c4   : > { %v4339_v16 = vpop.f32.mrb[37].mxu1 }
 0x5c5   : > { %v2062_v17 = vpop.f32.mrb[38].mxu1 }
 0x5c6   : > { %v2123_v19 = vpack.c.bf16 %v2062_v17, %v2059_v15  ;;  %v4340_v20 = vpop.f32.mrb[39].mxu1  ;;  %v2650_v15 = vstv %s3977_s5  ;;  %s3766_s5 = scalar_lea.sflag [#allocation4], %s5460_s15 }
 0x5c7   : > { %v2646_v20 = vpop.permute.xlu1 %2645 }
 0x5c8   : > { %4372 = vmatmul.mubr.msk.bf16.vlgmr.msra.gmra.mrb[16].mxu0 %vm2142_vm6, %v2123_v19 }
 0x5c9   : > { %4376 = vmatpush3.bf16.msra.mxu0 %v4708_v18  ;;  %4377 = vmatprep.mubr.msk.bf16.mxu0 %vm5132_vm5, %v5131_v10 }
 0x5ca   : > { %4381 = vmatprep.subr.bf16.mxu0 %v5131_v10 }
 0x5cb   : > { %v2067_v21 = vpop.f32.mrb[40].mxu1 }
 0x5cc   : > { %v4343_v22 = vpop.f32.mrb[41].mxu1 }
 0x5cd   : > { %v2070_v23 = vpop.f32.mrb[42].mxu1 }
 0x5ce   : > { %v2124_v24 = vpack.c.bf16 %v2070_v23, %v2067_v21  ;;  %v4344_v25 = vpop.f32.mrb[43].mxu1 }
 0x5d3   : > { %v2075_v27 = vpop.f32.mrb[44].mxu1 }
 0x5d4   : > { %4378 = vmatmul.mubr.msk.bf16.vlgmr.msra.gmra.mrb[16].mxu0 %vm2142_vm6, %v2122_v11  ;;  %v4347_v28 = vpop.f32.mrb[45].mxu1 }
 0x5d5   : > { %4382 = vmatpush3.bf16.msra.mxu0 %v4709_v26  ;;  %4383 = vmatprep.mubr.msk.bf16.mxu0 %vm5132_vm5, %v5131_v10  ;;  %v2078_v29 = vpop.f32.mrb[46].mxu1 }
 0x5d6   : > { %v2125_v30 = vpack.c.bf16 %v2078_v29, %v2075_v27  ;;  %v4348_v31 = vpop.f32.mrb[47].mxu1  ;;  %4387 = vmatprep.subr.bf16.mxu0 %v5131_v10 }
 0x5db   : > { %v2083_v32 = vpop.f32.mrb[48].mxu1 }
 0x5dc   : > { %v4351_v33 = vpop.f32.mrb[49].mxu1 }
 0x5dd   : > { %v2086_v35 = vpop.f32.mrb[50].mxu1 }
 0x5de   : > { %v2126_v36 = vpack.c.bf16 %v2086_v35, %v2083_v32  ;;  %v4352_v37 = vpop.f32.mrb[51].mxu1  ;;  %v4716_v35 = vld [vmem:[%s6016_s13] sm:$0xff]  }
 0x5df   : > { %v4718_v37 = vld [vmem:[%s6016_s13 + $0x10] sm:$0xff]  }
 0x5e0   : > { %4384 = vmatmul.mubr.msk.bf16.vlgmr.msra.gmra.mrb[16].mxu0 %vm2142_vm6, %v2124_v24 }
 0x5e1   : > { %4388 = vmatpush3.bf16.msra.mxu0 %v4710_v34  ;;  %4389 = vmatprep.mubr.msk.bf16.mxu0 %vm5132_vm5, %v5131_v10 }
 0x5e2   : > { %4393 = vmatprep.subr.bf16.mxu0 %v5131_v10 }
 0x5e3   : > { %v2091_v38 = vpop.f32.mrb[52].mxu1 }
 0x5e4   : > { %v4355_v39 = vpop.f32.mrb[53].mxu1 }
 0x5e5   : > { %v2094_v40 = vpop.f32.mrb[54].mxu1  ;;  %v4720_v39 = vld [vmem:[%s6016_s13 + $0x20] ss:$0 sps:$4 sm:$0xff]  }
 0x5e6   : > { %v2127_v41 = vpack.c.bf16 %v2094_v40, %v2091_v38  ;;  %v4356_v42 = vpop.f32.mrb[55].mxu1  ;;  %v4719_v38 = vld [vmem:[%s6016_s13 + $0x18] sm:$0xff]  }
 0x5e7   : > { %v4732_v40 = vld [vmem:[#allocation11 + $0x74] ss:$8 sps:$4 sm:$0xff]   ;;  %v4735_v42 = vld [vmem:[#allocation11 + $0x4] ss:$8 sps:$4 sm:$0xff]  }
 0x5eb   : > { %v2099_v44 = vpop.f32.mrb[56].mxu1 }
 0x5ec   : > { %4390 = vmatmul.mubr.msk.bf16.vlgmr.msra.gmra.mrb[16].mxu0 %vm2142_vm6, %v2125_v30  ;;  %v4359_v45 = vpop.f32.mrb[57].mxu1 }
 0x5ed   : > { %4394 = vmatpush3.bf16.msra.mxu0 %v4711_v43  ;;  %4395 = vmatprep.mubr.msk.bf16.mxu0 %vm5132_vm5, %v5131_v10  ;;  %v2102_v46 = vpop.f32.mrb[58].mxu1 }
 0x5ee   : > { %4399 = vmatprep.subr.bf16.mxu0 %v5131_v10  ;;  %v2128_v47 = vpack.c.bf16 %v2102_v46, %v2099_v44  ;;  %v4360_v48 = vpop.f32.mrb[59].mxu1 }
 0x5f3   : > { %v2107_v49 = vpop.f32.mrb[60].mxu1 }
 0x5f4   : > { %v4363_v50 = vpop.f32.mrb[61].mxu1 }
 0x5f5   : > { %v2110_v52 = vpop.f32.mrb[62].mxu1  ;;  %v4736_v50 = vld [vmem:[#allocation11 + $0x10] ss:$8 sps:$4 sm:$0xff]  }
 0x5f6   : > { %v2129_v53 = vpack.c.bf16 %v2110_v52, %v2107_v49  ;;  %v4364_v54 = vpop.f32.mrb[63].mxu1  ;;  %v4738_v49 = vld [vmem:[#allocation11 + $0x14] ss:$8 sps:$4 sm:$0xff]   ;;  %v4741_v52 = vld [vmem:[#allocation11 + $0x24] ss:$8 sps:$4 sm:$0xff]  }
 0x5f8   : > { %4396 = vmatmul.mubr.msk.bf16.vlgmr.msra.gmra.mrb[16].mxu0 %vm2142_vm6, %v2126_v36  ;;  %v4717_v36 = vld [vmem:[%s6016_s13 + $0x8] sm:$0xff]  }
 0x5f9   : > { %4400 = vmatpush3.bf16.msra.mxu0 %v4712_v51  ;;  %4401 = vmatprep.mubr.msk.bf16.mxu0 %vm5132_vm5, %v5131_v10 }
 0x5fa   : > { %4405 = vmatprep.subr.bf16.mxu0 %v5131_v10 }
 0x5fb   : > { %v2115_v55 = vpop.f32.mrb[64].mxu1 }
 0x5fc   : > { %v4367_v56 = vpop.f32.mrb[65].mxu1 }
 0x5fd   : > { %v2118_v57 = vpop.f32.mrb[66].mxu1 }
 0x5fe   : > { %v2130_v59 = vpack.c.bf16 %v2118_v57, %v2115_v55  ;;  %v4368_v61 = vpop.f32.mrb[67].mxu1  ;;  %v4739_v57 = vld [vmem:[#allocation11 + $0x20] ss:$8 sps:$4 sm:$0xff]  }
 0x5ff   : > { %v4742_v61 = vld [vmem:[#allocation11 + $0x30] ss:$8 sps:$4 sm:$0xff]  }
 0x604   : > { %4402 = vmatmul.mubr.msk.bf16.vlgmr.msra.gmra.mrb[16].mxu0 %vm2142_vm6, %v2127_v41  ;;  %v4730_v41 = vld [vmem:[#allocation11 + $0x70] ss:$8 sps:$4 sm:$0xff]  }
 0x605   : > { %4406 = vmatpush3.bf16.msra.mxu0 %v4713_v62  ;;  %4407 = vmatprep.mubr.msk.bf16.mxu0 %vm5132_vm5, %v5131_v10 }
 0x606   : > { %4411 = vmatprep.subr.bf16.mxu0 %v5131_v10 }
 0x610   : > { %4408 = vmatmul.mubr.msk.bf16.vlgmr.msra.gmra.mrb[16].mxu0 %vm2142_vm6, %v2128_v47 }
 0x611   : > { %4412 = vmatpush3.bf16.msra.mxu0 %v4714_v0  ;;  %4413 = vmatprep.mubr.msk.bf16.mxu0 %vm5132_vm5, %v5131_v10  ;;  %v4747_v0 = vld [vmem:[#allocation11 + $0x84] ss:$8 sps:$4 sm:$0xff]  }
 0x612   : > { %4417 = vmatprep.subr.bf16.mxu0 %v5131_v10 }
 0x61c   : > { %4414 = vmatmul.mubr.msk.bf16.vlgmr.msra.gmra.mrb[16].mxu0 %vm2142_vm6, %v2129_v53 }
 0x61d   : > { %4418 = vmatpush3.bf16.msra.mxu0 %v4715_v1  ;;  %4419 = vmatprep.mubr.msk.bf16.mxu0 %vm5132_vm5, %v5131_v10 }
 0x61e   : > { %2856 = vmatprep.subr.bf16.mxu0 %v4723_v7 }
 0x628   : > { %4420 = vmatmul.mubr.msk.bf16.vlgmr.msra.gmra.mrb[16].mxu0 %vm2142_vm6, %v2130_v59  ;;  %v4744_v59 = vld [vmem:[#allocation11 + $0x34] ss:$8 sps:$4 sm:$0xff]  }
 0x629   : > { %2888 = vmatprep.mubr.bf16.mxu0 %v5130_v2  ;;  %2857 = vmatpush1.bf16.msra.mxu0 %v4721_v5 }
 0x62a   : > { %2858 = vmatprep.subr.bf16.mxu0 %v4726_v8 }
 0x62d   : > { %2859 = vmatpush1.bf16.msra.mxu0 %v4724_v60  ;;  %v4745_v60 = vld [vmem:[#allocation11 + $0x80] ss:$8 sps:$4 sm:$0xff]  }
 0x62e   : > { %2860 = vmatprep.subr.bf16.mxu0 %v4729_v4  ;;  %v4750_v4 = vld [vmem:[#allocation11 + $0x94] ss:$8 sps:$4 sm:$0xff]  }
 0x631   : > { %2861 = vmatpush1.bf16.msra.mxu0 %v4727_v58  ;;  %v4748_v58 = vld [vmem:[#allocation11 + $0x90] ss:$8 sps:$4 sm:$0xff]  }
 0x632   : > { %2862 = vmatprep.subr.bf16.mxu0 %v4732_v40  ;;  %v4781_v40 = vld [vmem:[#allocation11 + $0x140] ss:$8 sps:$4 sm:$0xff]  }
 0x635   : > { %2863 = vmatpush1.bf16.msra.mxu0 %v4730_v41  ;;  %v4786_v41 = vld [vmem:[#allocation11 + $0x154] ss:$8 sps:$4 sm:$0xff]  }
 0x636   : > { %2940 = vmatprep.subr.bf16.mxu0 %v4735_v42  ;;  %v4784_v42 = vld [vmem:[#allocation11 + $0x150] ss:$8 sps:$4 sm:$0xff]  }
 0x6fb   : > { %v2613_v9 = vpop.f32.mrb[16].mxu0 }
 0x6fc   : > { %v2634_v11 = vmul.f32 %v2627_v63, %v2613_v9  ;;  %v4421_v12 = vpop.f32.mrb[17].mxu0 }
 0x6fd   : > { %v2616_v16 = vpop.f32.mrb[18].mxu0 }
 0x6fe   : > { %v2648_v17 = vadd.f32 %v2641_v6, %v2634_v11  ;;  %v2635_v18 = vmul.f32 %v2632_v3, %v2616_v16  ;;  %v4422_v19 = vpop.f32.mrb[19].mxu0  ;;  %v4753_v3 = vld [vmem:[#allocation11 + $0xa4] ss:$8 sps:$4 sm:$0xff]   ;;  %v4756_v16 = vld [vmem:[#allocation11 + $0xb4] ss:$8 sps:$4 sm:$0xff]  }
 0x6ff   : > { %v4759_v19 = vld [vmem:[#allocation11 + $0xc4] ss:$8 sps:$4 sm:$0xff]  }
 0x700   : > { %v2651_v21 = vmul.f32 %v2650_v15, %v2648_v17  ;;  %v2649_v22 = vadd.f32 %v2646_v20, %v2635_v18 }
 0x702   : > { %v4030_v23 = vmul.f32 -1.442695, %v2651_v21  ;;  %v2652_v24 = vmul.f32 %v2650_v15, %v2649_v22  ;;  %v4751_v15 = vld [vmem:[#allocation11 + $0xa0] ss:$8 sps:$4 sm:$0xff]  }
 0x704   : > { %4861 = vpow2.f32 %v4030_v23  ;;  %v4031_v25 = vmul.f32 -1.442695, %v2652_v24  ;;  %v4757_v23 = vld [vmem:[#allocation11 + $0xc0] ss:$8 sps:$4 sm:$0xff]   ;;  %v4762_v24 = vld [vmem:[#allocation11 + $0xd4] ss:$8 sps:$4 sm:$0xff]  }
 0x706   : > { %4863 = vpow2.f32 %v4031_v25  ;;  %v4760_v25 = vld [vmem:[#allocation11 + $0xd0] ss:$8 sps:$4 sm:$0xff]  }
 0x70e   : > { %v4862_v26 = vpop.eup %4861 }
 0x70f   : > { %v2659_v27 = vadd.f32 1.0, %v4862_v26  ;;  %v4765_v26 = vld [vmem:[#allocation11 + $0xe4] ss:$8 sps:$4 sm:$0xff]  }
 0x710   : > { %v4864_v28 = vpop.eup %4863 }
 0x711   : > { %4865 = vrcp.f32 %v2659_v27  ;;  %v2660_v29 = vadd.f32 1.0, %v4864_v28  ;;  %v4763_v27 = vld [vmem:[#allocation11 + $0xe0] ss:$8 sps:$4 sm:$0xff]   ;;  %v4768_v28 = vld [vmem:[#allocation11 + $0xf4] ss:$8 sps:$4 sm:$0xff]  }
 0x713   : > { %4867 = vrcp.f32 %v2660_v29  ;;  %v4766_v29 = vld [vmem:[#allocation11 + $0xf0] ss:$8 sps:$4 sm:$0xff]  }
 0x71b   : > { %v4866_v30 = vpop.eup %4865 }
 0x71c   : > { %v2665_v32 = vmul.f32 %v4866_v30, %v2648_v17  ;;  %v4754_v17 = vld [vmem:[#allocation11 + $0xb0] ss:$8 sps:$4 sm:$0xff]   ;;  %v4771_v30 = vld [vmem:[#allocation11 + $0x104] ss:$8 sps:$4 sm:$0xff]  }
 0x71d   : > { %v4868_v31 = vpop.eup %4867 }
 0x71e   : > { %v2666_v33 = vmul.f32 %v4868_v31, %v2649_v22  ;;  %v4769_v31 = vld [vmem:[#allocation11 + $0x100] ss:$8 sps:$4 sm:$0xff]  }
 0x720   : > { %v2677_v34 = vpack.c.bf16 %v2666_v33, %v2665_v32  ;;  %v4774_v33 = vld [vmem:[#allocation11 + $0x114] ss:$8 sps:$4 sm:$0xff]  }
 0x722   : > { %4424 = vmatpush3.bf16.msra.mxu1 %v2677_v34  ;;  %v4772_v34 = vld [vmem:[#allocation11 + $0x110] ss:$8 sps:$4 sm:$0xff]  }
 0x725   : > { %4426 = vmatmul.mubr.msk.bf16.vlgmr.msra.gmra.mrb[68].mxu1 %vm2142_vm6, %v4716_v35  ;;  %v4777_v35 = vld [vmem:[#allocation11 + $0x124] ss:$8 sps:$4 sm:$0xff]  }
 0x726   : > { %4429 = vmatprep.mubr.msk.bf16.mxu1 %vm5132_vm5, %v5131_v10 }
 0x72d   : > { %4430 = vmatmul.mubr.msk.bf16.gmra.mrb[72].mxu1 %vm2142_vm6, %v4717_v36  ;;  %v4775_v36 = vld [vmem:[#allocation11 + $0x120] ss:$8 sps:$4 sm:$0xff]  }
 0x72e   : > { %4433 = vmatprep.mubr.msk.bf16.mxu1 %vm5132_vm5, %v5131_v10 }
 0x735   : > { %4434 = vmatmul.mubr.msk.bf16.gmra.mrb[76].mxu1 %vm2142_vm6, %v4718_v37  ;;  %v4780_v37 = vld [vmem:[#allocation11 + $0x134] ss:$8 sps:$4 sm:$0xff]  }
 0x736   : > { %4437 = vmatprep.mubr.msk.bf16.mxu1 %vm5132_vm5, %v5131_v10 }
 0x73d   : > { %4438 = vmatmul.mubr.msk.bf16.gmra.mrb[80].mxu1 %vm2142_vm6, %v4719_v38  ;;  %v4778_v38 = vld [vmem:[#allocation11 + $0x130] ss:$8 sps:$4 sm:$0xff]  }
 0x73e   : > { %4441 = vmatprep.mubr.msk.bf16.mxu1 %vm5132_vm5, %v5131_v10  ;;  %v4733_v10 = vld [vmem:[#allocation11] ss:$8 sps:$4 sm:$0xff]  }
 0x745   : > { %4442 = vmatmul.mubr.msk.bf16.gmra.mrb[84].mxu1 %vm2142_vm6, %v4720_v39  ;;  %v4783_v39 = vld [vmem:[#allocation11 + $0x144] ss:$8 sps:$4 sm:$0xff]  }
 0x746   : > { %3733 = vmatprep.mubr.bf16.mxu1 %v5130_v2 }
 0x7f8   : > { %v2750_v43 = vpop.f32.mrb[68].mxu1 }
 0x7f9   : > { %v4427_v44 = vpop.f32.mrb[69].mxu1 }
 0x7fa   : > { %v2753_v45 = vpop.f32.mrb[70].mxu1  ;;  %v4787_v44 = vld [vmem:[#allocation11 + $0x160] ss:$8 sps:$4 sm:$0xff]  }
 0x7fb   : > { %v2788_v46 = vpack.c.bf16 %v2753_v45, %v2750_v43  ;;  %v4428_v47 = vpop.f32.mrb[71].mxu1  ;;  %v4789_v43 = vld [vmem:[#allocation11 + $0x164] ss:$8 sps:$4 sm:$0xff]   ;;  %v4792_v45 = vld [vmem:[#allocation11 + $0x174] ss:$8 sps:$4 sm:$0xff]  }
 0x7fc   : > { %v4795_v47 = vld [vmem:[#allocation11 + $0x184] ss:$8 sps:$4 sm:$0xff]  }
 0x7fd   : > { %v2811_v48 = vrot.slane %v2788_v46, 4 }
 0x7ff   : > { %4051 = vmatmul.mubr.msk.bf16.vlgmr.msra.gmra.mrb[20].mxu0 %vm2852_vm7, %v2811_v48 }
 0x800   : > { %2941 = vmatpush1.bf16.msra.mxu0 %v4733_v10  ;;  %2972 = vmatprep.mubr.bf16.mxu0 %v5130_v2  ;;  %v2758_v51 = vpop.f32.mrb[72].mxu1  ;;  %v4793_v10 = vld [vmem:[#allocation11 + $0x180] ss:$8 sps:$4 sm:$0xff]  }
 0x801   : > { %2942 = vmatprep.subr.bf16.mxu0 %v4738_v49  ;;  %v4431_v53 = vpop.f32.mrb[73].mxu1  ;;  %v4798_v49 = vld [vmem:[#allocation11 + $0x194] ss:$8 sps:$4 sm:$0xff]  }
 0x802   : > { %v2761_v54 = vpop.f32.mrb[74].mxu1  ;;  %v4804_v53 = vld [vmem:[#allocation11 + $0x1b4] ss:$8 sps:$4 sm:$0xff]  }
 0x803   : > { %v5854_v55 = vpack.c.bf16 %v2761_v54, %v2758_v51  ;;  %v4432_v56 = vpop.f32.mrb[75].mxu1  ;;  %v4801_v51 = vld [vmem:[#allocation11 + $0x1a4] ss:$8 sps:$4 sm:$0xff]   ;;  %v4802_v54 = vld [vmem:[#allocation11 + $0x1b0] ss:$8 sps:$4 sm:$0xff]  }
 0x804   : > { %2943 = vmatpush1.bf16.msra.mxu0 %v4736_v50  ;;  %v4796_v50 = vld [vmem:[#allocation11 + $0x190] ss:$8 sps:$4 sm:$0xff]   ;;  %v4805_v56 = vld [vmem:[#allocation11 + $0x1c0] ss:$8 sps:$4 sm:$0xff]  }
 0x805   : > { %2944 = vmatprep.subr.bf16.mxu0 %v4741_v52  ;;  %v3086_v32 = vrot.slane %v5854_v55, 4  ;;  %v4799_v52 = vld [vmem:[#allocation11 + $0x1a0] ss:$8 sps:$4 sm:$0xff]  }
 0x808   : > { %2945 = vmatpush1.bf16.msra.mxu0 %v4739_v57  ;;  %v2766_v62 = vpop.f32.mrb[76].mxu1  ;;  %v4810_v57 = vld [vmem:[#allocation11 + $0x1d4] ss:$8 sps:$4 sm:$0xff]  }
 0x809   : > { %2946 = vmatprep.subr.bf16.mxu0 %v4744_v59  ;;  %v4435_v1 = vpop.f32.mrb[77].mxu1  ;;  %v4808_v59 = vld [vmem:[#allocation11 + $0x1d0] ss:$8 sps:$4 sm:$0xff]  }
 0x80a   : > { %v2769_v5 = vpop.f32.mrb[78].mxu1  ;;  %v4814_v1 = vld [vmem:[#allocation11 + $0x1f0] ss:$8 sps:$4 sm:$0xff]  }
 0x80b   : > { %v5856_v7 = vpack.c.bf16 %v2769_v5, %v2766_v62  ;;  %v4436_v8 = vpop.f32.mrb[79].mxu1  ;;  %v4811_v62 = vld [vmem:[#allocation11 + $0x1e0] ss:$8 sps:$4 sm:$0xff]   ;;  %v4819_v5 = vld [vmem:[#allocation11 + $0x204] ss:$8 sps:$4 sm:$0xff]  }
 0x80c   : > { %2947 = vmatpush1.bf16.msra.mxu0 %v4742_v61  ;;  %v4813_v61 = vld [vmem:[#allocation11 + $0x1e4] ss:$8 sps:$4 sm:$0xff]  }
 0x80d   : > { %3033 = vmatprep.subr.bf16.mxu0 %v4747_v0  ;;  %v3278_v48 = vrot.slane %v5856_v7, 4  ;;  %v4816_v0 = vld [vmem:[#allocation11 + $0x1f4] ss:$8 sps:$4 sm:$0xff]  }
 0x80f   : > { %4060 = vmatmul.mubr.msk.bf16.vlgmr.msra.gmra.mrb[20].mxu0 %vm2852_vm7, %v2788_v46  ;;  %v4790_v46 = vld [vmem:[#allocation11 + $0x170] ss:$8 sps:$4 sm:$0xff]  }
 0x810   : > { %3034 = vmatpush1.bf16.msra.mxu0 %v4745_v60  ;;  %3065 = vmatprep.mubr.bf16.mxu0 %v5130_v2  ;;  %v2774_v63 = vpop.f32.mrb[80].mxu1  ;;  %v4822_v60 = vld [vmem:[#allocation11 + $0x214] ss:$8 sps:$4 sm:$0xff]  }
 0x811   : > { %3035 = vmatprep.subr.bf16.mxu0 %v4750_v4  ;;  %v4439_v6 = vpop.f32.mrb[81].mxu1  ;;  %v4820_v4 = vld [vmem:[#allocation11 + $0x210] ss:$8 sps:$4 sm:$0xff]  }
 0x812   : > { %v2777_v9 = vpop.f32.mrb[82].mxu1  ;;  %v4826_v6 = vld [vmem:[#allocation11 + $0x230] ss:$8 sps:$4 sm:$0xff]  }
 0x813   : > { %v5860_v11 = vpack.c.bf16 %v2777_v9, %v2774_v63  ;;  %v4440_v12 = vpop.f32.mrb[83].mxu1  ;;  %v4823_v63 = vld [vmem:[#allocation11 + $0x220] ss:$8 sps:$4 sm:$0xff]  }
 0x814   : > { %3036 = vmatpush1.bf16.msra.mxu0 %v4748_v58  ;;  %v4825_v58 = vld [vmem:[#allocation11 + $0x224] ss:$8 sps:$4 sm:$0xff]  }
 0x815   : > { %3037 = vmatprep.subr.bf16.mxu0 %v4753_v3  ;;  %v3470_v8 = vrot.slane %v5860_v11, 4  ;;  %v4828_v3 = vld [vmem:[#allocation11 + $0x234] ss:$8 sps:$4 sm:$0xff]  }
 0x818   : > { %3038 = vmatpush1.bf16.msra.mxu0 %v4751_v15  ;;  %v5862_v18 = vpop.f32.mrb[84].mxu1 }
 0x819   : > { %3039 = vmatprep.subr.bf16.mxu0 %v4756_v16  ;;  %v4443_v20 = vpop.f32.mrb[85].mxu1  ;;  %v2792_v9 = vpack.c.bf16 %v5862_v18, %v5862_v18 }
 0x81a   : > { %v2785_v21 = vpop.f32.mrb[86].mxu1 }
 0x81b   : > { %v4444_v22 = vpop.f32.mrb[87].mxu1 }
 0x81c   : > { %3040 = vmatpush1.bf16.msra.mxu0 %v4754_v17  ;;  %v3668_v17 = vstv %s4032_s24  ;;  %s5895_s24 = scalar_lea.hbm %s6018_s17, %s4134_s3 }
 0x81d   : > { %3130 = vmatprep.subr.bf16.mxu0 %v4759_v19 }
 0x81f   : > { %4069 = vmatmul.mubr.msk.bf16.vlgmr.msra.gmra.mrb[20].mxu0 %vm2852_vm7, %v5854_v55  ;;  %v4807_v55 = vld [vmem:[#allocation11 + $0x1c4] ss:$8 sps:$4 sm:$0xff]  }
 0x820   : > { %3131 = vmatpush1.bf16.msra.mxu0 %v4757_v23  ;;  %3162 = vmatprep.mubr.bf16.mxu0 %v5130_v2 }
 0x821   : > { %3132 = vmatprep.subr.bf16.mxu0 %v4762_v24 }
 0x824   : > { %3133 = vmatpush1.bf16.msra.mxu0 %v4760_v25 }
 0x825   : > { %3134 = vmatprep.subr.bf16.mxu0 %v4765_v26 }
 0x828   : > { %3135 = vmatpush1.bf16.msra.mxu0 %v4763_v27 }
 0x829   : > { %3136 = vmatprep.subr.bf16.mxu0 %v4768_v28 }
 0x82c   : > { %3137 = vmatpush1.bf16.msra.mxu0 %v4766_v29 }
 0x82d   : > { %3225 = vmatprep.subr.bf16.mxu0 %v4771_v30 }
 0x82f   : > { %4078 = vmatmul.mubr.msk.bf16.vlgmr.msra.gmra.mrb[20].mxu0 %vm2852_vm7, %v3086_v32 }
 0x830   : > { %3226 = vmatpush1.bf16.msra.mxu0 %v4769_v31  ;;  %3257 = vmatprep.mubr.bf16.mxu0 %v5130_v2 }
 0x831   : > { %3227 = vmatprep.subr.bf16.mxu0 %v4774_v33 }
 0x834   : > { %3228 = vmatpush1.bf16.msra.mxu0 %v4772_v34 }
 0x835   : > { %3229 = vmatprep.subr.bf16.mxu0 %v4777_v35 }
 0x838   : > { %3230 = vmatpush1.bf16.msra.mxu0 %v4775_v36 }
 0x839   : > { %3231 = vmatprep.subr.bf16.mxu0 %v4780_v37 }
 0x83c   : > { %3232 = vmatpush1.bf16.msra.mxu0 %v4778_v38  ;;  %v3685_v38 = vld [vmem:[%s6017_s19] sm:$0x1]  ;;  %s5040_s19 = sshll.u32 %s5134_s1, 4  ;;  %s5041_s19 = int_to_ptr.vmem [resolvable:$false] %s5040_s19 }
 0x83d   : > { %3322 = vmatprep.subr.bf16.mxu0 %v4783_v39  ;;  %v5133_v39 = vmov 1966171168   ;;  %p5043_p7 = scmp.lt.s32.totalorder %s5897_s11, %s5041_s19 }
 0x83f   : > { %4087 = vmatmul.mubr.msk.bf16.vlgmr.msra.gmra.mrb[20].mxu0 %vm2852_vm7, %v5856_v7  ;;  %v4817_v7 = vld [vmem:[#allocation11 + $0x200] ss:$8 sps:$4 sm:$0xff]  }
 0x840   : > { %3323 = vmatpush1.bf16.msra.mxu0 %v4781_v40  ;;  %3354 = vmatprep.mubr.bf16.mxu0 %v5130_v2  ;;  %v3746_v40 = vunpack.c.l.s4 %v5133_v39 }
 0x841   : > { %3324 = vmatprep.subr.bf16.mxu0 %v4786_v41  ;;  %v3689_v41 = vstv %s4126_s2  ;;  %s5042_s2 = scalar_lea.vmem %s5041_s19, 64 }
 0x842   : > { %p5044_p9 = scmp.lt.s32.totalorder %s5042_s2, %s5036_s20 }
 0x844   : > { %3325 = vmatpush1.bf16.msra.mxu0 %v4784_v42  ;;  %v3747_v42 = vunpack.c.0.s8 %v3746_v40  ;;  %p5045_p13 = por %p5044_p9, %p5043_p7 }
 0x845   : > { %3326 = vmatprep.subr.bf16.mxu0 %v4789_v43 }
 0x846   : > { %p5046_p8 = pnand %p5045_p13, %p5039_p3 }
 0x848   : > { %3327 = vmatpush1.bf16.msra.mxu0 %v4787_v44 }
 0x849   : > { %3328 = vmatprep.subr.bf16.mxu0 %v4792_v45 }
 0x84c   : > { %3329 = vmatpush1.bf16.msra.mxu0 %v4790_v46 }
 0x84d   : > { %3417 = vmatprep.subr.bf16.mxu0 %v4795_v47  ;;  %v3750_v47 = vsub.s32 %v3747_v42, %v5518_v14 }
 0x84f   : > { %4096 = vmatmul.mubr.msk.bf16.vlgmr.msra.gmra.mrb[20].mxu0 %vm2852_vm7, %v3278_v48 }
 0x850   : > { %3418 = vmatpush1.bf16.msra.mxu0 %v4793_v10  ;;  %3449 = vmatprep.mubr.bf16.mxu0 %v5130_v2 }
 0x851   : > { %3419 = vmatprep.subr.bf16.mxu0 %v4798_v49 }
 0x854   : > { %3420 = vmatpush1.bf16.msra.mxu0 %v4796_v50 }
 0x855   : > { %3421 = vmatprep.subr.bf16.mxu0 %v4801_v51 }
 0x858   : > { %3422 = vmatpush1.bf16.msra.mxu0 %v4799_v52 }
 0x859   : > { %3423 = vmatprep.subr.bf16.mxu0 %v4804_v53 }
 0x85c   : > { %3424 = vmatpush1.bf16.msra.mxu0 %v4802_v54 }
 0x85d   : > { %3514 = vmatprep.subr.bf16.mxu0 %v4807_v55 }
 0x85f   : > { %4105 = vmatmul.mubr.msk.bf16.vlgmr.msra.gmra.mrb[20].mxu0 %vm2852_vm7, %v5860_v11  ;;  %v3656_v11 = vpop.permute.xlu1 %3655 }
 0x860   : > { %3515 = vmatpush1.bf16.msra.mxu0 %v4805_v56  ;;  %3546 = vmatprep.mubr.bf16.mxu0 %v5130_v2 }
 0x861   : > { %3516 = vmatprep.subr.bf16.mxu0 %v4810_v57 }
 0x863   : > { %v3664_v16 = vpop.permute.xlu1 %3663 }
 0x864   : > { %3517 = vmatpush1.bf16.msra.mxu0 %v4808_v59 }
 0x865   : > { %3518 = vmatprep.subr.bf16.mxu0 %v4813_v61 }
 0x868   : > { %3519 = vmatpush1.bf16.msra.mxu0 %v4811_v62 }
 0x869   : > { %3520 = vmatprep.subr.bf16.mxu0 %v4816_v0 }
 0x86c   : > { %3521 = vmatpush1.bf16.msra.mxu0 %v4814_v1 }
 0x86d   : > { %3609 = vmatprep.subr.bf16.mxu0 %v4819_v5 }
 0x86f   : > { %4114 = vmatmul.mubr.msk.bf16.vlgmr.msra.gmra.mrb[20].mxu0 %vm2852_vm7, %v3470_v8 }
 0x870   : > { %3610 = vmatpush1.bf16.msra.mxu0 %v4817_v7  ;;  %3641 = vmatprep.mubr.bf16.mxu0 %v5130_v2 }
 0x871   : > { %3611 = vmatprep.subr.bf16.mxu0 %v4822_v60 }
 0x874   : > { %3612 = vmatpush1.bf16.msra.mxu0 %v4820_v4 }
 0x875   : > { %3613 = vmatprep.subr.bf16.mxu0 %v4825_v58 }
 0x878   : > { %3614 = vmatpush1.bf16.msra.mxu0 %v4823_v63 }
 0x879   : > { %3615 = vmatprep.subr.bf16.mxu0 %v4828_v3 }
 0x87c   : > { %3616 = vmatpush1.bf16.msra.mxu0 %v4826_v6 }
 0x87f   : > { %4123 = vmatmul.mubr.msk.bf16.vlgmr.msra.gmra.mrb[20].mxu0 %vm2852_vm7, %v2792_v9 }
 0x952   : > { %v3643_v12 = vpop.f32.mrb[20].mxu0 }
 0x953   : > { %v3658_v15 = vmul.f32 %v3656_v11, %v3643_v12  ;;  %v3645_v2 = vpop.f32.mrb[21].mxu0 }
 0x954   : > { %v3659_v19 = vmul.f32 %v3656_v11, %v3645_v2  ;;  %v3647_v20 = vpop.f32.mrb[22].mxu0 }
 0x955   : > { %v3666_v21 = vadd.f32 %v3664_v16, %v3658_v15  ;;  %v3648_v22 = vpop.f32.mrb[23].mxu0 }
 0x956   : > { %v3667_v23 = vadd.f32 %v3664_v16, %v3659_v19 }
 0x957   : > { %v3669_v24 = vmul.f32 %v3668_v17, %v3666_v21 }
 0x958   : > { %v3670_v25 = vmul.f32 %v3668_v17, %v3667_v23 }
 0x959   : > { %v4124_v26 = vmul.f32 -1.442695, %v3669_v24 }
 0x95a   : > { %v4125_v27 = vmul.f32 -1.442695, %v3670_v25 }
 0x95b   : > { %4869 = vpow2.f32 %v4124_v26 }
 0x95c   : > { %4871 = vpow2.f32 %v4125_v27 }
 0x965   : > { %v4870_v18 = vpop.eup %4869 }
 0x966   : > { %v4872_v28 = vpop.eup %4871  ;;  %v3677_v29 = vadd.f32 1.0, %v4870_v18 }
 0x967   : > { %v3678_v30 = vadd.f32 1.0, %v4872_v28 }
 0x968   : > { %4873 = vrcp.f32 %v3677_v29 }
 0x969   : > { %4875 = vrcp.f32 %v3678_v30 }
 0x972   : > { %v4874_v31 = vpop.eup %4873 }
 0x973   : > { %v4876_v32 = vpop.eup %4875  ;;  %v3683_v33 = vmul.f32 %v4874_v31, %v3666_v21 }
 0x974   : > { %v3684_v34 = vmul.f32 %v4876_v32, %v3667_v23 }
 0x975   : > { %v3686_v35 = vpack.c.bf16 %v3683_v33, %v3683_v33 }
 0x976   : > { %v3687_v36 = vpack.c.bf16 %v3684_v34, %v3684_v34 }
 0x977   : > { %v3696_v37 = vsel %vm3694_vm8, %v3686_v35, 0 }
 0x978   : > { %4127 = vmatprep.subr.msk.bf16.mxu1 %vm3694_vm8, %v3687_v36 }
 0x979   : > { %3702 = vmatpush1.bf16.msra.mxu1 %v3696_v37 }
 0x97c   : > { %4128 = vmatmul.mubr.msk.bf16.vlgmr.msra.gmra.mrb[88].mxu1 %vm3690_vm9, %v3685_v38 }
 0xa4f   : > { %v3735_v43 = vpop.f32.mrb[88].mxu1 }
 0xa50   : > { %v3736_v44 = vadd.f32 %v3735_v43, %v3689_v41  ;;  %v3737_v45 = vpop.f32.mrb[89].mxu1 }
 0xa51   : > { %v3738_v46 = vadd.f32 %v3737_v45, %v3689_v41  ;;  %v3739_v10 = vpop.f32.mrb[90].mxu1 }
 0xa52   : > { %v3740_v48 = vpop.f32.mrb[91].mxu1 }
 0xa53   : > { %v3744_v49 = vcombine.low %v3736_v44, %v3738_v46 }
 0xa55   : > { %v3751_v50 = vrot.slane %v3744_v49, %v3750_v47 }
 0xa57   : > { %v3758_v51 = vrot.slane %v3751_v50, %v3750_v47 }
 0xa59   : > { %3764 = vst.msk [vmem:[%s676_s9] sm:$0x3] %vm3762_vm10, %v3758_v51 }
 0xa5a   : > { %5049 = shalt.err (!%p5046_p8)
}
 0xa5b   : > { %s5050_s15 = scalar_lea.hbm %s5895_s24, 32  ;;  %s5054_s9 = scalar_lea.hbm %s6018_s17, 64 }
 0xa5c   : > { %p5051_p6 = scmp.ne.s32.totalorder %s5895_s24, %s5050_s15  ;;  %p5055_p11 = scmp.lt.u32.totalorder %s5895_s24, %s6018_s17 }
 0xa5d   : > { %p5056_p12 = scmp.lt.u32.totalorder %s5054_s9, %s5050_s15  ;;  %p5058_p2 = scmp.lt.u32.totalorder %s5050_s15, %s5895_s24 }
 0xa5e   : > { %p5052_p10 = pnand %p5051_p6, %p6019_p5 }
 0xa5f   : > { %p5057_p0 = por %p5056_p12, %p5055_p11 }
 0xa60   : > { %p5053_p4 = pneg %p5052_p10 }
 0xa61   : > { %p5059_p1 = por %p5058_p2, %p5057_p0 }
 0xa63   : > { %p5060_p3 = pnand %p5059_p1, %p5053_p4 }
 0xa65   : > { %5063 = shalt.err (!%p5060_p3)
}
 0xa66   : > { %4586 = dma.vmem_to_hbm [thread:$0]  (%p6019_p5), %s5897_s11, 32, %s5895_s24, %s3766_s5  }
 0xa67 PF: > { %s3792_s20 = sand.u32 1, %s5106_s27   ;;  %p6020_p7 = scmp.ne.s32.totalorder %s5998_s25, 0 }
 0xa68   : > { %p6021_p9 = scmp.ge.s32.totalorder %s5118_s30, 2  ;;  %s3793_s1 = scalar_lea.sflag [#allocation4], %s3792_s20 }
 0xa6a   : > { %p4609_p13 = pnand %p6021_p9, %p6020_p7 }
 0xa6c   : > { %5101 = dma.done.wait (!%p4609_p13), %s3793_s1, 32  }
 0xa6d   : > { %5103 = vsyncadd (!%p4609_p13), %s3793_s1, 4294967264  ;;  %s6022_s19 = sld [smem:[#allocation20_spill]]  ;;  %p36_p8 = scmp.ge.s32.totalorder %s5352_s21, 4  }
 0xa6e   : > { %s6023_s27 = smov %s5110_s28  ;;  %s6024_s28 = smov %s5114_s29 }
 0xa6f   : > { %s6026_s30 = smov %s5352_s21  ;;  %38 = sbr.rel (!%p36_p8) target bundleno = 25 (0x19), region = 191 }
 0xa73   : > { %s6025_s29 = smov %s6022_s19 }
 0xa76   :  { %3798 = vsyncpa [#allocation3], 1 }
 0xa77   :  { %3800 = vsyncpa [#allocation3 + $0x1], 1 }
 0xa78   :  { %3801 = vsyncpa [#allocation7], 1 }
 0xa79   :  { %3803 = vsyncpa [#allocation7 + $0x1], 1 }
 0xa7a   :  { %3804 = vsyncpa [#allocation10], 1 }
 0xa7b   :  { %3805 = vsyncpa [#allocation4], 1 }
 0xa7c   :  { %3807 = vsyncpa [#allocation4 + $0x1], 1 }
 0xa7d   :  { %3808 = vsyncpa [#allocation5], 1 }
 0xa7e   :  { %3810 = vsyncpa [#allocation5 + $0x1], 1 }

</bundles_post_ra>
